<compile_context>
chip_gen: v7x
topology: tpu7x:2x2x1
jax: 0.10.0
libtpu: 0.0.40
codegen_flags: <defaults>
</compile_context>

<pallas_src>
import functools
import math

import jax
import jax.numpy as jnp
from jax import lax
from jax.experimental import pallas as pl
from jax.experimental.pallas import tpu as pltpu


# ---------------------------------------------------------------------------
# VMEM budget: 128 MiB physical on v5e/v6e -> ~64 MiB scoped limit,
#              64 MiB physical per TC on v7x -> ~32 MiB scoped limit.
# ---------------------------------------------------------------------------

def _pick_vmem_limit():
    cap = None
    try:
        info = pltpu.get_tpu_info()
        cap = getattr(info, "vmem_capacity_bytes", None)
    except Exception:
        cap = None
    if not cap:
        cap = 64 * 1024 * 1024  # conservative fallback (v7x-sized)
    return int(min(96 * 1024 * 1024, max(32 * 1024 * 1024, cap // 2)))


_VMEM_LIMIT = _pick_vmem_limit()


# ---------------------------------------------------------------------------
# tiling helpers
# ---------------------------------------------------------------------------

def _round_down(x, m):
    return max(m, (x // m) * m)


def _row_tile(rows, pref):
    """Sublane (second-to-last) tile: multiple of 8, or the full extent."""
    if pref >= rows:
        return rows
    return _round_down(pref, 8)


def _lane_tile(n, pref):
    """Lane (last) tile: multiple of 128, or the full extent."""
    if pref >= n:
        return n
    return _round_down(pref, 128)


def _k_tile(k, pref):
    """Reduction tile must divide K exactly (no OOB garbage in the acc).

    NOTE: if no 128-multiple divisor exists the whole reduction is done in one
    block; for very large non-round K this can pressure VMEM (flagged in the
    perf review) — fine for the transformer dims used here.
    """
    if k <= pref:
        return k
    t = _round_down(pref, 128)
    while t >= 128:
        if k % t == 0:
            return t
        t -= 128
    return k


# ---------------------------------------------------------------------------
# NormLayer kernel  (matches torch: unbiased std, eps added post-normalisation)
# ---------------------------------------------------------------------------

def _norm_kernel(x_ref, alpha_ref, bias_ref, o_ref, *, d_model, eps):
    x = x_ref[...].astype(jnp.float32)                      # (tile_rows, d_model)
    mean = jnp.mean(x, axis=-1, keepdims=True)
    centered = x - mean
    var = jnp.sum(centered * centered, axis=-1, keepdims=True) / (d_model - 1)
    inv_std = lax.rsqrt(var)                                 # EUP slot
    normed = centered * inv_std + eps                        # eps added post-norm
    alpha = alpha_ref[...].astype(jnp.float32)               # (1, d_model)
    bias = bias_ref[...].astype(jnp.float32)                 # (1, d_model)
    o_ref[...] = (alpha * normed + bias).astype(o_ref.dtype)


def norm_layer(x, alpha, bias, *, eps=1e-6, tile_rows=512):
    orig_shape = x.shape
    d_model = orig_shape[-1]
    rows = x.size // d_model
    x2 = x.reshape(rows, d_model)

    # Cap row tile so double-buffered in + out (~4 live copies) fit comfortably.
    bytes_per_row = d_model * x.dtype.itemsize
    budget = _VMEM_LIMIT // 3
    max_rows_by_vmem = max(8, budget // (4 * bytes_per_row))
    tr = _row_tile(rows, min(tile_rows, max_rows_by_vmem))

    cost = pl.CostEstimate(
        flops=int(8 * rows * d_model),
        transcendentals=int(rows),
        bytes_accessed=int(2 * rows * d_model * x.dtype.itemsize + 2 * d_model * 4),
    )

    out = pl.pallas_call(
        functools.partial(_norm_kernel, d_model=d_model, eps=eps),
        out_shape=jax.ShapeDtypeStruct((rows, d_model), x.dtype),
        grid_spec=pltpu.PrefetchScalarGridSpec(
            num_scalar_prefetch=0,
            grid=(pl.cdiv(rows, tr),),
            in_specs=[
                pl.BlockSpec((tr, d_model), lambda i: (i, 0)),
                pl.BlockSpec((1, d_model), lambda i: (0, 0)),
                pl.BlockSpec((1, d_model), lambda i: (0, 0)),
            ],
            out_specs=pl.BlockSpec((tr, d_model), lambda i: (i, 0)),
        ),
        compiler_params=pltpu.CompilerParams(
            dimension_semantics=("parallel",),
            vmem_limit_bytes=_VMEM_LIMIT,
        ),
        cost_estimate=cost,
    )(x2, alpha.reshape(1, d_model), bias.reshape(1, d_model))
    return out.reshape(orig_shape)


# ---------------------------------------------------------------------------
# Linear kernel: matmul + bias, optional fused ReLU and fused residual add.
# f32 output accumulates directly into the resident output block (no scratch);
# MXU operands cast to bf16 in-kernel, accumulation stays f32.
# ---------------------------------------------------------------------------

def _linear_kernel(*refs, activation, has_residual):
    if has_residual:
        x_ref, w_ref, b_ref, res_ref, o_ref = refs
    else:
        x_ref, w_ref, b_ref, o_ref = refs
        res_ref = None

    k = pl.program_id(2)

    @pl.when(k == 0)
    def _():
        o_ref[...] = jnp.zeros_like(o_ref)

    o_ref[...] += jnp.dot(x_ref[...].astype(jnp.bfloat16),
                          w_ref[...].astype(jnp.bfloat16),
                          preferred_element_type=jnp.float32)

    @pl.when(k == pl.num_programs(2) - 1)
    def _():
        out = o_ref[...] + b_ref[...].astype(jnp.float32)
        if activation == "relu":
            out = jnp.maximum(out, 0.0)
        if has_residual:
            out = out + res_ref[...].astype(jnp.float32)
        o_ref[...] = out


def linear(x2, w, b, *, activation=None, residual=None, tm=256, tn=512, tk=512):
    """x2: (M, K); w: (K, N); b: (N,); residual: optional (M, N). Returns (M, N)."""
    M, K = x2.shape
    Kw, N = w.shape
    assert K == Kw
    assert x2.dtype == jnp.float32  # in-place f32 accumulation into the output

    tm_ = _row_tile(M, tm)
    tn_ = _lane_tile(N, tn)
    tk_ = _k_tile(K, tk)
    has_residual = residual is not None

    in_specs = [
        pl.BlockSpec((tm_, tk_), lambda i, j, k: (i, k)),
        pl.BlockSpec((tk_, tn_), lambda i, j, k: (k, j)),
        pl.BlockSpec((1, tn_), lambda i, j, k: (0, j)),
    ]
    inputs = [x2, w, b.reshape(1, N)]
    if has_residual:
        in_specs.append(pl.BlockSpec((tm_, tn_), lambda i, j, k: (i, j)))
        inputs.append(residual.reshape(M, N))

    cost = pl.CostEstimate(
        flops=int(2 * M * N * K),
        transcendentals=0,
        bytes_accessed=int((M * K + K * N + M * N + N
                            + (M * N if has_residual else 0)) * 4),
    )

    return pl.pallas_call(
        functools.partial(_linear_kernel, activation=activation,
                          has_residual=has_residual),
        out_shape=jax.ShapeDtypeStruct((M, N), x2.dtype),
        grid_spec=pltpu.PrefetchScalarGridSpec(
            num_scalar_prefetch=0,
            grid=(pl.cdiv(M, tm_), pl.cdiv(N, tn_), K // tk_),
            in_specs=in_specs,
            out_specs=pl.BlockSpec((tm_, tn_), lambda i, j, k: (i, j)),
        ),
        compiler_params=pltpu.CompilerParams(
            dimension_semantics=("parallel", "parallel", "arbitrary"),
            vmem_limit_bytes=_VMEM_LIMIT,
        ),
        cost_estimate=cost,
    )(*inputs)


# ---------------------------------------------------------------------------
# Attention kernel: one batch per grid step, all heads handled in-kernel on
# static lane slices of the (S, D) block; single lane-dense (1, S, D) store.
# Mask (if any) is consumed as the raw int mask, converted to -1e9 in-kernel.
# ---------------------------------------------------------------------------
# TODO(synk): whole-sequence KV per batch; a flash-style KV-tiled variant (and
# head packing along the sublane axis for better MXU fill with d_head=32) is
# still needed for long sequences, especially on v7x (64 MiB VMEM/TC).

def _attention_kernel(*refs, scale, heads, has_mask, fused_qkv):
    if fused_qkv:
        qkv = refs[0][0]                               # (S, 3*D) f32
        d_model = qkv.shape[-1] // 3
        q = qkv[:, :d_model]
        k = qkv[:, d_model:2 * d_model]
        v = qkv[:, 2 * d_model:]
        idx = 1
    else:
        q = refs[0][0]                                 # (S, D)
        kv = refs[1][0]                                # (T, 2*D)
        d_model = q.shape[-1]
        k = kv[:, :d_model]
        v = kv[:, d_model:]
        idx = 2

    if has_mask:
        mask = refs[idx][0]                            # (S, T) int32
        idx += 1
    else:
        mask = None
    o_ref = refs[idx]

    d_head = d_model // heads
    outs = []
    for h in range(heads):                             # static trace-time loop
        sl = slice(h * d_head, (h + 1) * d_head)
        qh = q[:, sl].astype(jnp.bfloat16)
        kh = k[:, sl].astype(jnp.bfloat16)
        vh = v[:, sl].astype(jnp.bfloat16)
        s = lax.dot_general(qh, kh, (((1,), (1,)), ((), ())),
                            preferred_element_type=jnp.float32) * scale
        if mask is not None:
            s = jnp.where(mask == 0, -1e9, s)
        m = jnp.max(s, axis=-1, keepdims=True)
        p = jnp.exp(s - m)
        denom = jnp.sum(p, axis=-1, keepdims=True)
        ctx = jnp.dot(p.astype(jnp.bfloat16), vh,
                      preferred_element_type=jnp.float32)
        outs.append(ctx * pl.reciprocal(denom, approx=True))

    o_ref[0] = jnp.concatenate(outs, axis=-1).astype(o_ref.dtype)


def multi_head_attention(q_in, kv_in, params, mask, *, heads, self_attention,
                         residual=None):
    B, S, D = q_in.shape
    T = kv_in.shape[1]
    d_head = D // heads
    scale = 1.0 / math.sqrt(d_head)

    if self_attention:
        # Fused QKV projection: activation read once, N = 3*D.
        w_qkv = jnp.concatenate([params["wq"], params["wk"], params["wv"]], axis=1)
        b_qkv = jnp.concatenate([params["bq"], params["bk"], params["bv"]])
        qkv = linear(q_in.reshape(-1, D), w_qkv, b_qkv).reshape(B, S, 3 * D)
        attn_inputs = [qkv]
        in_specs = [pl.BlockSpec((1, S, 3 * D), lambda b: (b, 0, 0))]
    else:
        # Fused KV projection of the encoder output; Q projected separately.
        w_kv = jnp.concatenate([params["wk"], params["wv"]], axis=1)
        b_kv = jnp.concatenate([params["bk"], params["bv"]])
        q = linear(q_in.reshape(-1, D), params["wq"], params["bq"]).reshape(B, S, D)
        kv = linear(kv_in.reshape(-1, D), w_kv, b_kv).reshape(B, T, 2 * D)
        attn_inputs = [q, kv]
        in_specs = [pl.BlockSpec((1, S, D), lambda b: (b, 0, 0)),
                    pl.BlockSpec((1, T, 2 * D), lambda b: (b, 0, 0))]

    has_mask = mask is not None
    if has_mask:
        mask_i32 = jnp.broadcast_to(mask, (B, S, T)).astype(jnp.int32)
        attn_inputs.append(mask_i32)
        in_specs.append(pl.BlockSpec((1, S, T), lambda b: (b, 0, 0)))

    cost = pl.CostEstimate(
        flops=int(4 * B * heads * S * T * d_head),
        transcendentals=int(B * heads * S * T),
        bytes_accessed=int(4 * (B * S * 3 * D + B * S * D
                                + (B * S * T if has_mask else 0))),
    )

    ctx = pl.pallas_call(
        functools.partial(_attention_kernel, scale=scale, heads=heads,
                          has_mask=has_mask, fused_qkv=self_attention),
        out_shape=jax.ShapeDtypeStruct((B, S, D), q_in.dtype),
        grid_spec=pltpu.PrefetchScalarGridSpec(
            num_scalar_prefetch=0,
            grid=(B,),
            in_specs=in_specs,
            out_specs=pl.BlockSpec((1, S, D), lambda b: (b, 0, 0)),
        ),
        compiler_params=pltpu.CompilerParams(
            dimension_semantics=("parallel",),
            vmem_limit_bytes=_VMEM_LIMIT,
        ),
        cost_estimate=cost,
    )(*attn_inputs)

    # Output projection with the residual add fused into the epilogue.
    res2d = None if residual is None else residual.reshape(-1, D)
    out = linear(ctx.reshape(-1, D), params["wo"], params["bo"], residual=res2d)
    return out.reshape(B, S, D)


# ---------------------------------------------------------------------------
# FeedForward and DecoderLayer forward
# ---------------------------------------------------------------------------

def feed_forward(x, params, *, residual=None):
    B, S, D = x.shape
    h = linear(x.reshape(-1, D), params["w1"], params["b1"], activation="relu")
    # TODO(synk): dropout treated as identity (inference / eval mode).
    res2d = None if residual is None else residual.reshape(-1, D)
    out = linear(h, params["w2"], params["b2"], residual=res2d)
    return out.reshape(B, S, D)


def decoder_layer(x, encoder_out, src_mask, trg_mask, params, *, heads):
    # residual base is the *normalised* activation, exactly as in the source;
    # the residual add is fused into the epilogue of each block's last matmul.
    n1 = norm_layer(x, params["norm1_alpha"], params["norm1_bias"])
    x = multi_head_attention(n1, n1, params["att1"], trg_mask,
                             heads=heads, self_attention=True, residual=n1)
    n2 = norm_layer(x, params["norm2_alpha"], params["norm2_bias"])
    x = multi_head_attention(n2, encoder_out, params["att2"], src_mask,
                             heads=heads, self_attention=False, residual=n2)
    n3 = norm_layer(x, params["norm3_alpha"], params["norm3_bias"])
    x = feed_forward(n3, params["ffn"], residual=n3)
    return x


# ---------------------------------------------------------------------------
# Pure-JAX reference (same semantics) for validation
# ---------------------------------------------------------------------------

_HI = jax.lax.Precision.HIGHEST


def _ref_norm(x, alpha, bias, eps=1e-6):
    mean = jnp.mean(x, axis=-1, keepdims=True)
    var = jnp.sum((x - mean) ** 2, axis=-1, keepdims=True) / (x.shape[-1] - 1)
    return alpha * ((x - mean) / jnp.sqrt(var) + eps) + bias


def _ref_linear(x, w, b):
    return jnp.dot(x, w, precision=_HI) + b


def _ref_attention(q_in, k_in, v_in, p, mask, heads):
    B, S, D = q_in.shape
    T = k_in.shape[1]
    dh = D // heads
    q = _ref_linear(q_in, p["wq"], p["bq"]).reshape(B, S, heads, dh).transpose(0, 2, 1, 3)
    k = _ref_linear(k_in, p["wk"], p["bk"]).reshape(B, T, heads, dh).transpose(0, 2, 1, 3)
    v = _ref_linear(v_in, p["wv"], p["bv"]).reshape(B, T, heads, dh).transpose(0, 2, 1, 3)
    s = jnp.einsum("bhqd,bhkd->bhqk", q, k, precision=_HI) / math.sqrt(dh)
    if mask is not None:
        s = jnp.where(mask[:, None, :, :] == 0, -1e9, s)
    a = jax.nn.softmax(s, axis=-1)
    o = jnp.einsum("bhqk,bhkd->bhqd", a, v, precision=_HI)
    o = o.transpose(0, 2, 1, 3).reshape(B, S, D)
    return _ref_linear(o, p["wo"], p["bo"])


def _ref_ffn(x, p):
    h = jnp.maximum(_ref_linear(x, p["w1"], p["b1"]), 0.0)
    return _ref_linear(h, p["w2"], p["b2"])


def _ref_decoder_layer(x, encoder_out, src_mask, trg_mask, params, heads):
    n1 = _ref_norm(x, params["norm1_alpha"], params["norm1_bias"])
    x = n1 + _ref_attention(n1, n1, n1, params["att1"], trg_mask, heads)
    n2 = _ref_norm(x, params["norm2_alpha"], params["norm2_bias"])
    x = n2 + _ref_attention(n2, encoder_out, encoder_out, params["att2"], src_mask, heads)
    n3 = _ref_norm(x, params["norm3_alpha"], params["norm3_bias"])
    x = n3 + _ref_ffn(n3, params["ffn"])
    return x


# ---------------------------------------------------------------------------
# demo / self-test
# ---------------------------------------------------------------------------

def _linear_params(key, fan_in, fan_out):
    kw, kb = jax.random.split(key)
    bound = 1.0 / math.sqrt(fan_in)
    w = jax.random.uniform(kw, (fan_in, fan_out), jnp.float32, -bound, bound)
    b = jax.random.uniform(kb, (fan_out,), jnp.float32, -bound, bound)
    return w, b


def _attn_params(key, d_model):
    ks = jax.random.split(key, 4)
    wq, bq = _linear_params(ks[0], d_model, d_model)
    wk, bk = _linear_params(ks[1], d_model, d_model)
    wv, bv = _linear_params(ks[2], d_model, d_model)
    wo, bo = _linear_params(ks[3], d_model, d_model)
    return dict(wq=wq, bq=bq, wk=wk, bk=bk, wv=wv, bv=bv, wo=wo, bo=bo)


if __name__ == "__main__":
    key = jax.random.PRNGKey(0)
    batch, seq, d_model, heads, d_ff = 2, 8, 128, 4, 256  # d_model lane-dense (128)

    ks = jax.random.split(key, 8)
    x = jax.random.normal(ks[0], (batch, seq, d_model), dtype=jnp.float32)
    encoder_out = jax.random.normal(ks[1], (batch, seq, d_model), dtype=jnp.float32)

    w1, b1 = _linear_params(ks[4], d_model, d_ff)
    w2, b2 = _linear_params(ks[5], d_ff, d_model)
    params = dict(
        norm1_alpha=jnp.ones((d_model,), jnp.float32),
        norm1_bias=jnp.zeros((d_model,), jnp.float32),
        norm2_alpha=jnp.ones((d_model,), jnp.float32),
        norm2_bias=jnp.zeros((d_model,), jnp.float32),
        norm3_alpha=jnp.ones((d_model,), jnp.float32),
        norm3_bias=jnp.zeros((d_model,), jnp.float32),
        att1=_attn_params(ks[2], d_model),
        att2=_attn_params(ks[3], d_model),
        ffn=dict(w1=w1, b1=b1, w2=w2, b2=b2),
    )

    trg_mask = jnp.broadcast_to(
        jnp.tril(jnp.ones((seq, seq), jnp.int32)), (batch, seq, seq))  # causal
    src_mask = jnp.ones((batch, seq, seq), jnp.int32)

    fwd = jax.jit(decoder_layer, static_argnames=("heads",))
    out = fwd(x, encoder_out, src_mask, trg_mask, params, heads=heads)
    out = jax.block_until_ready(out)

    ref = _ref_decoder_layer(x, encoder_out, src_mask, trg_mask, params, heads)
    assert out.shape == x.shape
    # tolerance accounts for bf16 MXU operands (f32 accumulation) vs f32 XLA ref
    assert jnp.allclose(out, ref, atol=2e-2, rtol=2e-2)
    print("KERNEL_OK")
</pallas_src>

<mosaic_0001>
module attributes {stable_mosaic.version = 11 : i64} {
  func.func @_norm_kernel(%arg0: i32, %arg1: memref<16x128xf32, #tpu.memory_space<vmem>>, %arg2: memref<1x128xf32, #tpu.memory_space<vmem>>, %arg3: memref<1x128xf32, #tpu.memory_space<vmem>>, %arg4: memref<16x128xf32, #tpu.memory_space<vmem>>) attributes {dimension_semantics = [#tpu.dimension_semantics<parallel>], iteration_bounds = array<i64: 1>, scalar_prefetch = 0 : i64, scratch_operands = 0 : i64, tpu.core_type = #tpu.core_type<tc>, window_params = [{transform_indices = @transform_0, window_bounds = array<i64: 16, 128>}, {pipeline_mode = #tpu.pipeline_mode<synchronous>, transform_indices = @transform_1, window_bounds = array<i64: 1, 128>}, {pipeline_mode = #tpu.pipeline_mode<synchronous>, transform_indices = @transform_2, window_bounds = array<i64: 1, 128>}, {transform_indices = @transform_3, window_bounds = array<i64: 16, 128>}]} {
    %c0 = arith.constant 0 : index
    %c0_0 = arith.constant 0 : index
    %0 = vector.load %arg1[%c0, %c0_0] : memref<16x128xf32, #tpu.memory_space<vmem>>, vector<16x128xf32>
    %cst = arith.constant dense<0.000000e+00> : vector<16xf32>
    %1 = vector.multi_reduction <add>, %0, %cst [1] : vector<16x128xf32> to vector<16xf32>
    %2 = vector.shape_cast %1 : vector<16xf32> to vector<16x1xf32>
    %cst_1 = arith.constant 1.280000e+02 : f32
    %3 = vector.broadcast %cst_1 : f32 to vector<16x1xf32>
    %4 = arith.divf %2, %3 : vector<16x1xf32>
    %5 = vector.broadcast %4 : vector<16x1xf32> to vector<16x128xf32>
    %6 = arith.subf %0, %5 : vector<16x128xf32>
    %7 = arith.mulf %6, %6 : vector<16x128xf32>
    %cst_2 = arith.constant dense<0.000000e+00> : vector<16xf32>
    %8 = vector.multi_reduction <add>, %7, %cst_2 [1] : vector<16x128xf32> to vector<16xf32>
    %9 = vector.shape_cast %8 : vector<16xf32> to vector<16x1xf32>
    %cst_3 = arith.constant 1.270000e+02 : f32
    %10 = vector.broadcast %cst_3 : f32 to vector<16x1xf32>
    %11 = arith.divf %9, %10 : vector<16x1xf32>
    %12 = math.rsqrt %11 : vector<16x1xf32>
    %13 = vector.broadcast %12 : vector<16x1xf32> to vector<16x128xf32>
    %14 = arith.mulf %6, %13 : vector<16x128xf32>
    %cst_4 = arith.constant 9.99999997E-7 : f32
    %15 = vector.broadcast %cst_4 : f32 to vector<16x128xf32>
    %16 = arith.addf %14, %15 : vector<16x128xf32>
    %c0_5 = arith.constant 0 : index
    %c0_6 = arith.constant 0 : index
    %17 = vector.load %arg2[%c0_5, %c0_6] : memref<1x128xf32, #tpu.memory_space<vmem>>, vector<1x128xf32>
    %c0_7 = arith.constant 0 : index
    %c0_8 = arith.constant 0 : index
    %18 = vector.load %arg3[%c0_7, %c0_8] : memref<1x128xf32, #tpu.memory_space<vmem>>, vector<1x128xf32>
    %19 = vector.broadcast %17 : vector<1x128xf32> to vector<16x128xf32>
    %20 = arith.mulf %19, %16 : vector<16x128xf32>
    %21 = vector.broadcast %18 : vector<1x128xf32> to vector<16x128xf32>
    %22 = arith.addf %20, %21 : vector<16x128xf32>
    %c0_9 = arith.constant 0 : index
    %c0_10 = arith.constant 0 : index
    %23 = vector.load %arg4[%c0_9, %c0_10] : memref<16x128xf32, #tpu.memory_space<vmem>>, vector<16x128xf32>
    tpu.vector_store %arg4[%c0_9, %c0_10], %22 {strides = array<i32>} : memref<16x128xf32, #tpu.memory_space<vmem>>, vector<16x128xf32>,
    return
  }
  func.func @transform_0(%arg0: i32) -> (i32, i32) {
    %c0_i32 = arith.constant 0 : i32
    %c0_i32_0 = arith.constant 0 : i32
    return %arg0, %c0_i32 : i32, i32
  }
  func.func @transform_1(%arg0: i32) -> (i32, i32) {
    %c0_i32 = arith.constant 0 : i32
    %c0_i32_0 = arith.constant 0 : i32
    %c0_i32_1 = arith.constant 0 : i32
    return %c0_i32, %c0_i32_0 : i32, i32
  }
  func.func @transform_2(%arg0: i32) -> (i32, i32) {
    %c0_i32 = arith.constant 0 : i32
    %c0_i32_0 = arith.constant 0 : i32
    %c0_i32_1 = arith.constant 0 : i32
    return %c0_i32, %c0_i32_0 : i32, i32
  }
  func.func @transform_3(%arg0: i32) -> (i32, i32) {
    %c0_i32 = arith.constant 0 : i32
    %c0_i32_0 = arith.constant 0 : i32
    return %arg0, %c0_i32 : i32, i32
  }
}

module attributes {stable_mosaic.version = 11 : i64} {
  func.func @_linear_kernel(%arg0: i32, %arg1: i32, %arg2: i32, %arg3: memref<16x128xf32, #tpu.memory_space<vmem>>, %arg4: memref<128x384xf32, #tpu.memory_space<vmem>>, %arg5: memref<1x384xf32, #tpu.memory_space<vmem>>, %arg6: memref<16x384xf32, #tpu.memory_space<vmem>>) attributes {dimension_semantics = [#tpu.dimension_semantics<parallel>, #tpu.dimension_semantics<parallel>, #tpu.dimension_semantics<arbitrary>], iteration_bounds = array<i64: 1, 1, 1>, scalar_prefetch = 0 : i64, scratch_operands = 0 : i64, tpu.core_type = #tpu.core_type<tc>, window_params = [{transform_indices = @transform_0, window_bounds = array<i64: 16, 128>}, {transform_indices = @transform_1, window_bounds = array<i64: 128, 384>}, {transform_indices = @transform_2, window_bounds = array<i64: 1, 384>}, {transform_indices = @transform_3, window_bounds = array<i64: 16, 384>}]} {
    %c0_i32 = arith.constant 0 : i32
    %0 = arith.cmpi eq, %arg2, %c0_i32 : i32
    %1 = arith.extui %0 : i1 to i32
    %c0_i32_0 = arith.constant 0 : i32
    %2 = arith.cmpi ne, %1, %c0_i32_0 : i32
    scf.if %2 {
      %cst_10 = arith.constant 0.000000e+00 : f32
      %14 = vector.broadcast %cst_10 : f32 to vector<16x384xf32>
      %c0_11 = arith.constant 0 : index
      %c0_12 = arith.constant 0 : index
      %15 = vector.load %arg6[%c0_11, %c0_12] : memref<16x384xf32, #tpu.memory_space<vmem>>, vector<16x384xf32>
      tpu.vector_store %arg6[%c0_11, %c0_12], %14 {strides = array<i32>} : memref<16x384xf32, #tpu.memory_space<vmem>>, vector<16x384xf32>,
    } else {
    }
    %c0 = arith.constant 0 : index
    %c0_1 = arith.constant 0 : index
    %3 = vector.load %arg6[%c0, %c0_1] : memref<16x384xf32, #tpu.memory_space<vmem>>, vector<16x384xf32>
    %c0_2 = arith.constant 0 : index
    %c0_3 = arith.constant 0 : index
    %4 = vector.load %arg3[%c0_2, %c0_3] : memref<16x128xf32, #tpu.memory_space<vmem>>, vector<16x128xf32>
    %5 = arith.truncf %4 : vector<16x128xf32> to vector<16x128xbf16>
    %c0_4 = arith.constant 0 : index
    %c0_5 = arith.constant 0 : index
    %6 = vector.load %arg4[%c0_4, %c0_5] : memref<128x384xf32, #tpu.memory_space<vmem>>, vector<128x384xf32>
    %7 = arith.truncf %6 : vector<128x384xf32> to vector<128x384xbf16>
    %cst = arith.constant dense<0.000000e+00> : vector<16x384xf32>
    %8 = tpu.matmul %5, %7, %cst {dimension_numbers = #tpu.dot_dimension_numbers<[1], [0], [0], [1], [0, 0, 1, 1], [], []>} : vector<16x128xbf16>, vector<128x384xbf16>, vector<16x384xf32> -> vector<16x384xf32>
    %9 = arith.addf %3, %8 : vector<16x384xf32>
    %c0_6 = arith.constant 0 : index
    %c0_7 = arith.constant 0 : index
    %10 = vector.load %arg6[%c0_6, %c0_7] : memref<16x384xf32, #tpu.memory_space<vmem>>, vector<16x384xf32>
    tpu.vector_store %arg6[%c0_6, %c0_7], %9 {strides = array<i32>} : memref<16x384xf32, #tpu.memory_space<vmem>>, vector<16x384xf32>,
    %c0_i32_8 = arith.constant 0 : i32
    %11 = arith.cmpi eq, %arg2, %c0_i32_8 : i32
    %12 = arith.extui %11 : i1 to i32
    %c0_i32_9 = arith.constant 0 : i32
    %13 = arith.cmpi ne, %12, %c0_i32_9 : i32
    scf.if %13 {
      %c0_10 = arith.constant 0 : index
      %c0_11 = arith.constant 0 : index
      %14 = vector.load %arg6[%c0_10, %c0_11] : memref<16x384xf32, #tpu.memory_space<vmem>>, vector<16x384xf32>
      %c0_12 = arith.constant 0 : index
      %c0_13 = arith.constant 0 : index
      %15 = vector.load %arg5[%c0_12, %c0_13] : memref<1x384xf32, #tpu.memory_space<vmem>>, vector<1x384xf32>
      %16 = vector.broadcast %15 : vector<1x384xf32> to vector<16x384xf32>
      %17 = arith.addf %14, %16 : vector<16x384xf32>
      %c0_14 = arith.constant 0 : index
      %c0_15 = arith.constant 0 : index
      %18 = vector.load %arg6[%c0_14, %c0_15] : memref<16x384xf32, #tpu.memory_space<vmem>>, vector<16x384xf32>
      tpu.vector_store %arg6[%c0_14, %c0_15], %17 {strides = array<i32>} : memref<16x384xf32, #tpu.memory_space<vmem>>, vector<16x384xf32>,
    } else {
    }
    return
  }
  func.func @transform_0(%arg0: i32, %arg1: i32, %arg2: i32) -> (i32, i32) {
    %c0_i32 = arith.constant 0 : i32
    return %arg0, %arg2 : i32, i32
  }
  func.func @transform_1(%arg0: i32, %arg1: i32, %arg2: i32) -> (i32, i32) {
    %c0_i32 = arith.constant 0 : i32
    return %arg2, %arg1 : i32, i32
  }
  func.func @transform_2(%arg0: i32, %arg1: i32, %arg2: i32) -> (i32, i32) {
    %c0_i32 = arith.constant 0 : i32
    %c0_i32_0 = arith.constant 0 : i32
    return %c0_i32, %arg1 : i32, i32
  }
  func.func @transform_3(%arg0: i32, %arg1: i32, %arg2: i32) -> (i32, i32) {
    %c0_i32 = arith.constant 0 : i32
    return %arg0, %arg1 : i32, i32
  }
}

module attributes {stable_mosaic.version = 11 : i64} {
  func.func @_linear_kernel(%arg0: i32, %arg1: i32, %arg2: i32, %arg3: memref<16x128xf32, #tpu.memory_space<vmem>>, %arg4: memref<128x128xf32, #tpu.memory_space<vmem>>, %arg5: memref<1x128xf32, #tpu.memory_space<vmem>>, %arg6: memref<16x128xf32, #tpu.memory_space<vmem>>, %arg7: memref<16x128xf32, #tpu.memory_space<vmem>>) attributes {dimension_semantics = [#tpu.dimension_semantics<parallel>, #tpu.dimension_semantics<parallel>, #tpu.dimension_semantics<arbitrary>], iteration_bounds = array<i64: 1, 1, 1>, scalar_prefetch = 0 : i64, scratch_operands = 0 : i64, tpu.core_type = #tpu.core_type<tc>, window_params = [{transform_indices = @transform_0, window_bounds = array<i64: 16, 128>}, {transform_indices = @transform_1, window_bounds = array<i64: 128, 128>}, {transform_indices = @transform_2, window_bounds = array<i64: 1, 128>}, {transform_indices = @transform_3, window_bounds = array<i64: 16, 128>}, {transform_indices = @transform_4, window_bounds = array<i64: 16, 128>}]} {
    %c0_i32 = arith.constant 0 : i32
    %0 = arith.cmpi eq, %arg2, %c0_i32 : i32
    %1 = arith.extui %0 : i1 to i32
    %c0_i32_0 = arith.constant 0 : i32
    %2 = arith.cmpi ne, %1, %c0_i32_0 : i32
    scf.if %2 {
      %cst_10 = arith.constant 0.000000e+00 : f32
      %14 = vector.broadcast %cst_10 : f32 to vector<16x128xf32>
      %c0_11 = arith.constant 0 : index
      %c0_12 = arith.constant 0 : index
      %15 = vector.load %arg7[%c0_11, %c0_12] : memref<16x128xf32, #tpu.memory_space<vmem>>, vector<16x128xf32>
      tpu.vector_store %arg7[%c0_11, %c0_12], %14 {strides = array<i32>} : memref<16x128xf32, #tpu.memory_space<vmem>>, vector<16x128xf32>,
    } else {
    }
    %c0 = arith.constant 0 : index
    %c0_1 = arith.constant 0 : index
    %3 = vector.load %arg7[%c0, %c0_1] : memref<16x128xf32, #tpu.memory_space<vmem>>, vector<16x128xf32>
    %c0_2 = arith.constant 0 : index
    %c0_3 = arith.constant 0 : index
    %4 = vector.load %arg3[%c0_2, %c0_3] : memref<16x128xf32, #tpu.memory_space<vmem>>, vector<16x128xf32>
    %5 = arith.truncf %4 : vector<16x128xf32> to vector<16x128xbf16>
    %c0_4 = arith.constant 0 : index
    %c0_5 = arith.constant 0 : index
    %6 = vector.load %arg4[%c0_4, %c0_5] : memref<128x128xf32, #tpu.memory_space<vmem>>, vector<128x128xf32>
    %7 = arith.truncf %6 : vector<128x128xf32> to vector<128x128xbf16>
    %cst = arith.constant dense<0.000000e+00> : vector<16x128xf32>
    %8 = tpu.matmul %5, %7, %cst {dimension_numbers = #tpu.dot_dimension_numbers<[1], [0], [0], [1], [0, 0, 1, 1], [], []>} : vector<16x128xbf16>, vector<128x128xbf16>, vector<16x128xf32> -> vector<16x128xf32>
    %9 = arith.addf %3, %8 : vector<16x128xf32>
    %c0_6 = arith.constant 0 : index
    %c0_7 = arith.constant 0 : index
    %10 = vector.load %arg7[%c0_6, %c0_7] : memref<16x128xf32, #tpu.memory_space<vmem>>, vector<16x128xf32>
    tpu.vector_store %arg7[%c0_6, %c0_7], %9 {strides = array<i32>} : memref<16x128xf32, #tpu.memory_space<vmem>>, vector<16x128xf32>,
    %c0_i32_8 = arith.constant 0 : i32
    %11 = arith.cmpi eq, %arg2, %c0_i32_8 : i32
    %12 = arith.extui %11 : i1 to i32
    %c0_i32_9 = arith.constant 0 : i32
    %13 = arith.cmpi ne, %12, %c0_i32_9 : i32
    scf.if %13 {
      %c0_10 = arith.constant 0 : index
      %c0_11 = arith.constant 0 : index
      %14 = vector.load %arg7[%c0_10, %c0_11] : memref<16x128xf32, #tpu.memory_space<vmem>>, vector<16x128xf32>
      %c0_12 = arith.constant 0 : index
      %c0_13 = arith.constant 0 : index
      %15 = vector.load %arg5[%c0_12, %c0_13] : memref<1x128xf32, #tpu.memory_space<vmem>>, vector<1x128xf32>
      %16 = vector.broadcast %15 : vector<1x128xf32> to vector<16x128xf32>
      %17 = arith.addf %14, %16 : vector<16x128xf32>
      %c0_14 = arith.constant 0 : index
      %c0_15 = arith.constant 0 : index
      %18 = vector.load %arg6[%c0_14, %c0_15] : memref<16x128xf32, #tpu.memory_space<vmem>>, vector<16x128xf32>
      %19 = arith.addf %17, %18 : vector<16x128xf32>
      %c0_16 = arith.constant 0 : index
      %c0_17 = arith.constant 0 : index
      %20 = vector.load %arg7[%c0_16, %c0_17] : memref<16x128xf32, #tpu.memory_space<vmem>>, vector<16x128xf32>
      tpu.vector_store %arg7[%c0_16, %c0_17], %19 {strides = array<i32>} : memref<16x128xf32, #tpu.memory_space<vmem>>, vector<16x128xf32>,
    } else {
    }
    return
  }
  func.func @transform_0(%arg0: i32, %arg1: i32, %arg2: i32) -> (i32, i32) {
    %c0_i32 = arith.constant 0 : i32
    return %arg0, %arg2 : i32, i32
  }
  func.func @transform_1(%arg0: i32, %arg1: i32, %arg2: i32) -> (i32, i32) {
    %c0_i32 = arith.constant 0 : i32
    return %arg2, %arg1 : i32, i32
  }
  func.func @transform_2(%arg0: i32, %arg1: i32, %arg2: i32) -> (i32, i32) {
    %c0_i32 = arith.constant 0 : i32
    %c0_i32_0 = arith.constant 0 : i32
    return %c0_i32, %arg1 : i32, i32
  }
  func.func @transform_3(%arg0: i32, %arg1: i32, %arg2: i32) -> (i32, i32) {
    %c0_i32 = arith.constant 0 : i32
    return %arg0, %arg1 : i32, i32
  }
  func.func @transform_4(%arg0: i32, %arg1: i32, %arg2: i32) -> (i32, i32) {
    %c0_i32 = arith.constant 0 : i32
    return %arg0, %arg1 : i32, i32
  }
}

module attributes {stable_mosaic.version = 11 : i64} {
  func.func @_attention_kernel(%arg0: i32, %arg1: memref<1x8x384xf32, #tpu.memory_space<vmem>>, %arg2: memref<1x8x8xi32, #tpu.memory_space<vmem>>, %arg3: memref<1x8x128xf32, #tpu.memory_space<vmem>>) attributes {dimension_semantics = [#tpu.dimension_semantics<parallel>], iteration_bounds = array<i64: 2>, scalar_prefetch = 0 : i64, scratch_operands = 0 : i64, tpu.core_type = #tpu.core_type<tc>, window_params = [{transform_indices = @transform_0, window_bounds = array<i64: 1, 8, 384>}, {transform_indices = @transform_1, window_bounds = array<i64: 1, 8, 8>}, {transform_indices = @transform_2, window_bounds = array<i64: 1, 8, 128>}]} {
    %c0 = arith.constant 0 : index
    %c0_0 = arith.constant 0 : index
    %c0_1 = arith.constant 0 : index
    %0 = vector.load %arg1[%c0, %c0_0, %c0_1] : memref<1x8x384xf32, #tpu.memory_space<vmem>>, vector<1x8x384xf32>
    %1 = vector.shape_cast %0 : vector<1x8x384xf32> to vector<8x384xf32>
    %2 = vector.extract_strided_slice %1 {offsets = [0, 0], sizes = [8, 128], strides = [1, 1]} : vector<8x384xf32> to vector<8x128xf32>
    %3 = vector.extract_strided_slice %1 {offsets = [0, 128], sizes = [8, 128], strides = [1, 1]} : vector<8x384xf32> to vector<8x128xf32>
    %4 = vector.extract_strided_slice %1 {offsets = [0, 256], sizes = [8, 128], strides = [1, 1]} : vector<8x384xf32> to vector<8x128xf32>
    %c0_2 = arith.constant 0 : index
    %c0_3 = arith.constant 0 : index
    %c0_4 = arith.constant 0 : index
    %5 = vector.load %arg2[%c0_2, %c0_3, %c0_4] : memref<1x8x8xi32, #tpu.memory_space<vmem>>, vector<1x8x8xi32>
    %6 = vector.shape_cast %5 : vector<1x8x8xi32> to vector<8x8xi32>
    %7 = vector.extract_strided_slice %2 {offsets = [0, 0], sizes = [8, 32], strides = [1, 1]} : vector<8x128xf32> to vector<8x32xf32>
    %8 = arith.truncf %7 : vector<8x32xf32> to vector<8x32xbf16>
    %9 = vector.extract_strided_slice %3 {offsets = [0, 0], sizes = [8, 32], strides = [1, 1]} : vector<8x128xf32> to vector<8x32xf32>
    %10 = arith.truncf %9 : vector<8x32xf32> to vector<8x32xbf16>
    %11 = vector.extract_strided_slice %4 {offsets = [0, 0], sizes = [8, 32], strides = [1, 1]} : vector<8x128xf32> to vector<8x32xf32>
    %12 = arith.truncf %11 : vector<8x32xf32> to vector<8x32xbf16>
    %cst = arith.constant dense<0.000000e+00> : vector<8x8xf32>
    %13 = tpu.matmul %8, %10, %cst {dimension_numbers = #tpu.dot_dimension_numbers<[1], [1], [0], [0], [0, 0, 1, 0], [], []>} : vector<8x32xbf16>, vector<8x32xbf16>, vector<8x8xf32> -> vector<8x8xf32>
    %cst_5 = arith.constant 0.176776692 : f32
    %14 = vector.broadcast %cst_5 : f32 to vector<8x8xf32>
    %15 = arith.mulf %13, %14 : vector<8x8xf32>
    %c0_i32 = arith.constant 0 : i32
    %16 = vector.broadcast %c0_i32 : i32 to vector<8x8xi32>
    %17 = arith.cmpi eq, %6, %16 : vector<8x8xi32>
    %cst_6 = arith.constant -1.000000e+09 : f32
    %18 = vector.broadcast %cst_6 : f32 to vector<8x8xf32>
    %19 = arith.select %17, %18, %15 : vector<8x8xi1>, vector<8x8xf32>
    %cst_7 = arith.constant dense<0xFF800000> : vector<8xf32>
    %20 = vector.multi_reduction <maximumf>, %19, %cst_7 [1] : vector<8x8xf32> to vector<8xf32>
    %21 = vector.shape_cast %20 : vector<8xf32> to vector<8x1xf32>
    %22 = vector.broadcast %21 : vector<8x1xf32> to vector<8x8xf32>
    %23 = arith.subf %19, %22 : vector<8x8xf32>
    %24 = math.exp %23 : vector<8x8xf32>
    %cst_8 = arith.constant dense<0.000000e+00> : vector<8xf32>
    %25 = vector.multi_reduction <add>, %24, %cst_8 [1] : vector<8x8xf32> to vector<8xf32>
    %26 = vector.shape_cast %25 : vector<8xf32> to vector<8x1xf32>
    %27 = arith.truncf %24 : vector<8x8xf32> to vector<8x8xbf16>
    %cst_9 = arith.constant dense<0.000000e+00> : vector<8x32xf32>
    %28 = tpu.matmul %27, %12, %cst_9 {dimension_numbers = #tpu.dot_dimension_numbers<[1], [0], [0], [1], [0, 0, 1, 1], [], []>} : vector<8x8xbf16>, vector<8x32xbf16>, vector<8x32xf32> -> vector<8x32xf32>
    %29 = tpu.reciprocal %26 {approx = true} : vector<8x1xf32> -> vector<8x1xf32>
    %30 = vector.broadcast %29 : vector<8x1xf32> to vector<8x32xf32>
    %31 = arith.mulf %28, %30 : vector<8x32xf32>
    %32 = vector.extract_strided_slice %2 {offsets = [0, 32], sizes = [8, 32], strides = [1, 1]} : vector<8x128xf32> to vector<8x32xf32>
    %33 = arith.truncf %32 : vector<8x32xf32> to vector<8x32xbf16>
    %34 = vector.extract_strided_slice %3 {offsets = [0, 32], sizes = [8, 32], strides = [1, 1]} : vector<8x128xf32> to vector<8x32xf32>
    %35 = arith.truncf %34 : vector<8x32xf32> to vector<8x32xbf16>
    %36 = vector.extract_strided_slice %4 {offsets = [0, 32], sizes = [8, 32], strides = [1, 1]} : vector<8x128xf32> to vector<8x32xf32>
    %37 = arith.truncf %36 : vector<8x32xf32> to vector<8x32xbf16>
    %cst_10 = arith.constant dense<0.000000e+00> : vector<8x8xf32>
    %38 = tpu.matmul %33, %35, %cst_10 {dimension_numbers = #tpu.dot_dimension_numbers<[1], [1], [0], [0], [0, 0, 1, 0], [], []>} : vector<8x32xbf16>, vector<8x32xbf16>, vector<8x8xf32> -> vector<8x8xf32>
    %cst_11 = arith.constant 0.176776692 : f32
    %39 = vector.broadcast %cst_11 : f32 to vector<8x8xf32>
    %40 = arith.mulf %38, %39 : vector<8x8xf32>
    %c0_i32_12 = arith.constant 0 : i32
    %41 = vector.broadcast %c0_i32_12 : i32 to vector<8x8xi32>
    %42 = arith.cmpi eq, %6, %41 : vector<8x8xi32>
    %cst_13 = arith.constant -1.000000e+09 : f32
    %43 = vector.broadcast %cst_13 : f32 to vector<8x8xf32>
    %44 = arith.select %42, %43, %40 : vector<8x8xi1>, vector<8x8xf32>
    %cst_14 = arith.constant dense<0xFF800000> : vector<8xf32>
    %45 = vector.multi_reduction <maximumf>, %44, %cst_14 [1] : vector<8x8xf32> to vector<8xf32>
    %46 = vector.shape_cast %45 : vector<8xf32> to vector<8x1xf32>
    %47 = vector.broadcast %46 : vector<8x1xf32> to vector<8x8xf32>
    %48 = arith.subf %44, %47 : vector<8x8xf32>
    %49 = math.exp %48 : vector<8x8xf32>
    %cst_15 = arith.constant dense<0.000000e+00> : vector<8xf32>
    %50 = vector.multi_reduction <add>, %49, %cst_15 [1] : vector<8x8xf32> to vector<8xf32>
    %51 = vector.shape_cast %50 : vector<8xf32> to vector<8x1xf32>
    %52 = arith.truncf %49 : vector<8x8xf32> to vector<8x8xbf16>
    %cst_16 = arith.constant dense<0.000000e+00> : vector<8x32xf32>
    %53 = tpu.matmul %52, %37, %cst_16 {dimension_numbers = #tpu.dot_dimension_numbers<[1], [0], [0], [1], [0, 0, 1, 1], [], []>} : vector<8x8xbf16>, vector<8x32xbf16>, vector<8x32xf32> -> vector<8x32xf32>
    %54 = tpu.reciprocal %51 {approx = true} : vector<8x1xf32> -> vector<8x1xf32>
    %55 = vector.broadcast %54 : vector<8x1xf32> to vector<8x32xf32>
    %56 = arith.mulf %53, %55 : vector<8x32xf32>
    %57 = vector.extract_strided_slice %2 {offsets = [0, 64], sizes = [8, 32], strides = [1, 1]} : vector<8x128xf32> to vector<8x32xf32>
    %58 = arith.truncf %57 : vector<8x32xf32> to vector<8x32xbf16>
    %59 = vector.extract_strided_slice %3 {offsets = [0, 64], sizes = [8, 32], strides = [1, 1]} : vector<8x128xf32> to vector<8x32xf32>
    %60 = arith.truncf %59 : vector<8x32xf32> to vector<8x32xbf16>
    %61 = vector.extract_strided_slice %4 {offsets = [0, 64], sizes = [8, 32], strides = [1, 1]} : vector<8x128xf32> to vector<8x32xf32>
    %62 = arith.truncf %61 : vector<8x32xf32> to vector<8x32xbf16>
    %cst_17 = arith.constant dense<0.000000e+00> : vector<8x8xf32>
    %63 = tpu.matmul %58, %60, %cst_17 {dimension_numbers = #tpu.dot_dimension_numbers<[1], [1], [0], [0], [0, 0, 1, 0], [], []>} : vector<8x32xbf16>, vector<8x32xbf16>, vector<8x8xf32> -> vector<8x8xf32>
    %cst_18 = arith.constant 0.176776692 : f32
    %64 = vector.broadcast %cst_18 : f32 to vector<8x8xf32>
    %65 = arith.mulf %63, %64 : vector<8x8xf32>
    %c0_i32_19 = arith.constant 0 : i32
    %66 = vector.broadcast %c0_i32_19 : i32 to vector<8x8xi32>
    %67 = arith.cmpi eq, %6, %66 : vector<8x8xi32>
    %cst_20 = arith.constant -1.000000e+09 : f32
    %68 = vector.broadcast %cst_20 : f32 to vector<8x8xf32>
    %69 = arith.select %67, %68, %65 : vector<8x8xi1>, vector<8x8xf32>
    %cst_21 = arith.constant dense<0xFF800000> : vector<8xf32>
    %70 = vector.multi_reduction <maximumf>, %69, %cst_21 [1] : vector<8x8xf32> to vector<8xf32>
    %71 = vector.shape_cast %70 : vector<8xf32> to vector<8x1xf32>
    %72 = vector.broadcast %71 : vector<8x1xf32> to vector<8x8xf32>
    %73 = arith.subf %69, %72 : vector<8x8xf32>
    %74 = math.exp %73 : vector<8x8xf32>
    %cst_22 = arith.constant dense<0.000000e+00> : vector<8xf32>
    %75 = vector.multi_reduction <add>, %74, %cst_22 [1] : vector<8x8xf32> to vector<8xf32>
    %76 = vector.shape_cast %75 : vector<8xf32> to vector<8x1xf32>
    %77 = arith.truncf %74 : vector<8x8xf32> to vector<8x8xbf16>
    %cst_23 = arith.constant dense<0.000000e+00> : vector<8x32xf32>
    %78 = tpu.matmul %77, %62, %cst_23 {dimension_numbers = #tpu.dot_dimension_numbers<[1], [0], [0], [1], [0, 0, 1, 1], [], []>} : vector<8x8xbf16>, vector<8x32xbf16>, vector<8x32xf32> -> vector<8x32xf32>
    %79 = tpu.reciprocal %76 {approx = true} : vector<8x1xf32> -> vector<8x1xf32>
    %80 = vector.broadcast %79 : vector<8x1xf32> to vector<8x32xf32>
    %81 = arith.mulf %78, %80 : vector<8x32xf32>
    %82 = vector.extract_strided_slice %2 {offsets = [0, 96], sizes = [8, 32], strides = [1, 1]} : vector<8x128xf32> to vector<8x32xf32>
    %83 = arith.truncf %82 : vector<8x32xf32> to vector<8x32xbf16>
    %84 = vector.extract_strided_slice %3 {offsets = [0, 96], sizes = [8, 32], strides = [1, 1]} : vector<8x128xf32> to vector<8x32xf32>
    %85 = arith.truncf %84 : vector<8x32xf32> to vector<8x32xbf16>
    %86 = vector.extract_strided_slice %4 {offsets = [0, 96], sizes = [8, 32], strides = [1, 1]} : vector<8x128xf32> to vector<8x32xf32>
    %87 = arith.truncf %86 : vector<8x32xf32> to vector<8x32xbf16>
    %cst_24 = arith.constant dense<0.000000e+00> : vector<8x8xf32>
    %88 = tpu.matmul %83, %85, %cst_24 {dimension_numbers = #tpu.dot_dimension_numbers<[1], [1], [0], [0], [0, 0, 1, 0], [], []>} : vector<8x32xbf16>, vector<8x32xbf16>, vector<8x8xf32> -> vector<8x8xf32>
    %cst_25 = arith.constant 0.176776692 : f32
    %89 = vector.broadcast %cst_25 : f32 to vector<8x8xf32>
    %90 = arith.mulf %88, %89 : vector<8x8xf32>
    %c0_i32_26 = arith.constant 0 : i32
    %91 = vector.broadcast %c0_i32_26 : i32 to vector<8x8xi32>
    %92 = arith.cmpi eq, %6, %91 : vector<8x8xi32>
    %cst_27 = arith.constant -1.000000e+09 : f32
    %93 = vector.broadcast %cst_27 : f32 to vector<8x8xf32>
    %94 = arith.select %92, %93, %90 : vector<8x8xi1>, vector<8x8xf32>
    %cst_28 = arith.constant dense<0xFF800000> : vector<8xf32>
    %95 = vector.multi_reduction <maximumf>, %94, %cst_28 [1] : vector<8x8xf32> to vector<8xf32>
    %96 = vector.shape_cast %95 : vector<8xf32> to vector<8x1xf32>
    %97 = vector.broadcast %96 : vector<8x1xf32> to vector<8x8xf32>
    %98 = arith.subf %94, %97 : vector<8x8xf32>
    %99 = math.exp %98 : vector<8x8xf32>
    %cst_29 = arith.constant dense<0.000000e+00> : vector<8xf32>
    %100 = vector.multi_reduction <add>, %99, %cst_29 [1] : vector<8x8xf32> to vector<8xf32>
    %101 = vector.shape_cast %100 : vector<8xf32> to vector<8x1xf32>
    %102 = arith.truncf %99 : vector<8x8xf32> to vector<8x8xbf16>
    %cst_30 = arith.constant dense<0.000000e+00> : vector<8x32xf32>
    %103 = tpu.matmul %102, %87, %cst_30 {dimension_numbers = #tpu.dot_dimension_numbers<[1], [0], [0], [1], [0, 0, 1, 1], [], []>} : vector<8x8xbf16>, vector<8x32xbf16>, vector<8x32xf32> -> vector<8x32xf32>
    %104 = tpu.reciprocal %101 {approx = true} : vector<8x1xf32> -> vector<8x1xf32>
    %105 = vector.broadcast %104 : vector<8x1xf32> to vector<8x32xf32>
    %106 = arith.mulf %103, %105 : vector<8x32xf32>
    %107 = tpu.concatenate %31, %56, %81, %106 in 1 : vector<8x32xf32>, vector<8x32xf32>, vector<8x32xf32>, vector<8x32xf32> -> vector<8x128xf32>
    %c0_31 = arith.constant 0 : index
    %c0_32 = arith.constant 0 : index
    %c0_33 = arith.constant 0 : index
    %108 = vector.load %arg3[%c0_31, %c0_32, %c0_33] : memref<1x8x128xf32, #tpu.memory_space<vmem>>, vector<1x8x128xf32>
    %109 = vector.shape_cast %108 : vector<1x8x128xf32> to vector<8x128xf32>
    %110 = vector.shape_cast %107 : vector<8x128xf32> to vector<1x8x128xf32>
    tpu.vector_store %arg3[%c0_31, %c0_32, %c0_33], %110 {strides = array<i32>} : memref<1x8x128xf32, #tpu.memory_space<vmem>>, vector<1x8x128xf32>,
    return
  }
  func.func @transform_0(%arg0: i32) -> (i32, i32, i32) {
    %c0_i32 = arith.constant 0 : i32
    %c0_i32_0 = arith.constant 0 : i32
    %c0_i32_1 = arith.constant 0 : i32
    return %arg0, %c0_i32, %c0_i32_0 : i32, i32, i32
  }
  func.func @transform_1(%arg0: i32) -> (i32, i32, i32) {
    %c0_i32 = arith.constant 0 : i32
    %c0_i32_0 = arith.constant 0 : i32
    %c0_i32_1 = arith.constant 0 : i32
    return %arg0, %c0_i32, %c0_i32_0 : i32, i32, i32
  }
  func.func @transform_2(%arg0: i32) -> (i32, i32, i32) {
    %c0_i32 = arith.constant 0 : i32
    %c0_i32_0 = arith.constant 0 : i32
    %c0_i32_1 = arith.constant 0 : i32
    return %arg0, %c0_i32, %c0_i32_0 : i32, i32, i32
  }
}

module attributes {stable_mosaic.version = 11 : i64} {
  func.func @_linear_kernel(%arg0: i32, %arg1: i32, %arg2: i32, %arg3: memref<16x128xf32, #tpu.memory_space<vmem>>, %arg4: memref<128x128xf32, #tpu.memory_space<vmem>>, %arg5: memref<1x128xf32, #tpu.memory_space<vmem>>, %arg6: memref<16x128xf32, #tpu.memory_space<vmem>>) attributes {dimension_semantics = [#tpu.dimension_semantics<parallel>, #tpu.dimension_semantics<parallel>, #tpu.dimension_semantics<arbitrary>], iteration_bounds = array<i64: 1, 1, 1>, scalar_prefetch = 0 : i64, scratch_operands = 0 : i64, tpu.core_type = #tpu.core_type<tc>, window_params = [{transform_indices = @transform_0, window_bounds = array<i64: 16, 128>}, {transform_indices = @transform_1, window_bounds = array<i64: 128, 128>}, {transform_indices = @transform_2, window_bounds = array<i64: 1, 128>}, {transform_indices = @transform_3, window_bounds = array<i64: 16, 128>}]} {
    %c0_i32 = arith.constant 0 : i32
    %0 = arith.cmpi eq, %arg2, %c0_i32 : i32
    %1 = arith.extui %0 : i1 to i32
    %c0_i32_0 = arith.constant 0 : i32
    %2 = arith.cmpi ne, %1, %c0_i32_0 : i32
    scf.if %2 {
      %cst_10 = arith.constant 0.000000e+00 : f32
      %14 = vector.broadcast %cst_10 : f32 to vector<16x128xf32>
      %c0_11 = arith.constant 0 : index
      %c0_12 = arith.constant 0 : index
      %15 = vector.load %arg6[%c0_11, %c0_12] : memref<16x128xf32, #tpu.memory_space<vmem>>, vector<16x128xf32>
      tpu.vector_store %arg6[%c0_11, %c0_12], %14 {strides = array<i32>} : memref<16x128xf32, #tpu.memory_space<vmem>>, vector<16x128xf32>,
    } else {
    }
    %c0 = arith.constant 0 : index
    %c0_1 = arith.constant 0 : index
    %3 = vector.load %arg6[%c0, %c0_1] : memref<16x128xf32, #tpu.memory_space<vmem>>, vector<16x128xf32>
    %c0_2 = arith.constant 0 : index
    %c0_3 = arith.constant 0 : index
    %4 = vector.load %arg3[%c0_2, %c0_3] : memref<16x128xf32, #tpu.memory_space<vmem>>, vector<16x128xf32>
    %5 = arith.truncf %4 : vector<16x128xf32> to vector<16x128xbf16>
    %c0_4 = arith.constant 0 : index
    %c0_5 = arith.constant 0 : index
    %6 = vector.load %arg4[%c0_4, %c0_5] : memref<128x128xf32, #tpu.memory_space<vmem>>, vector<128x128xf32>
    %7 = arith.truncf %6 : vector<128x128xf32> to vector<128x128xbf16>
    %cst = arith.constant dense<0.000000e+00> : vector<16x128xf32>
    %8 = tpu.matmul %5, %7, %cst {dimension_numbers = #tpu.dot_dimension_numbers<[1], [0], [0], [1], [0, 0, 1, 1], [], []>} : vector<16x128xbf16>, vector<128x128xbf16>, vector<16x128xf32> -> vector<16x128xf32>
    %9 = arith.addf %3, %8 : vector<16x128xf32>
    %c0_6 = arith.constant 0 : index
    %c0_7 = arith.constant 0 : index
    %10 = vector.load %arg6[%c0_6, %c0_7] : memref<16x128xf32, #tpu.memory_space<vmem>>, vector<16x128xf32>
    tpu.vector_store %arg6[%c0_6, %c0_7], %9 {strides = array<i32>} : memref<16x128xf32, #tpu.memory_space<vmem>>, vector<16x128xf32>,
    %c0_i32_8 = arith.constant 0 : i32
    %11 = arith.cmpi eq, %arg2, %c0_i32_8 : i32
    %12 = arith.extui %11 : i1 to i32
    %c0_i32_9 = arith.constant 0 : i32
    %13 = arith.cmpi ne, %12, %c0_i32_9 : i32
    scf.if %13 {
      %c0_10 = arith.constant 0 : index
      %c0_11 = arith.constant 0 : index
      %14 = vector.load %arg6[%c0_10, %c0_11] : memref<16x128xf32, #tpu.memory_space<vmem>>, vector<16x128xf32>
      %c0_12 = arith.constant 0 : index
      %c0_13 = arith.constant 0 : index
      %15 = vector.load %arg5[%c0_12, %c0_13] : memref<1x128xf32, #tpu.memory_space<vmem>>, vector<1x128xf32>
      %16 = vector.broadcast %15 : vector<1x128xf32> to vector<16x128xf32>
      %17 = arith.addf %14, %16 : vector<16x128xf32>
      %c0_14 = arith.constant 0 : index
      %c0_15 = arith.constant 0 : index
      %18 = vector.load %arg6[%c0_14, %c0_15] : memref<16x128xf32, #tpu.memory_space<vmem>>, vector<16x128xf32>
      tpu.vector_store %arg6[%c0_14, %c0_15], %17 {strides = array<i32>} : memref<16x128xf32, #tpu.memory_space<vmem>>, vector<16x128xf32>,
    } else {
    }
    return
  }
  func.func @transform_0(%arg0: i32, %arg1: i32, %arg2: i32) -> (i32, i32) {
    %c0_i32 = arith.constant 0 : i32
    return %arg0, %arg2 : i32, i32
  }
  func.func @transform_1(%arg0: i32, %arg1: i32, %arg2: i32) -> (i32, i32) {
    %c0_i32 = arith.constant 0 : i32
    return %arg2, %arg1 : i32, i32
  }
  func.func @transform_2(%arg0: i32, %arg1: i32, %arg2: i32) -> (i32, i32) {
    %c0_i32 = arith.constant 0 : i32
    %c0_i32_0 = arith.constant 0 : i32
    return %c0_i32, %arg1 : i32, i32
  }
  func.func @transform_3(%arg0: i32, %arg1: i32, %arg2: i32) -> (i32, i32) {
    %c0_i32 = arith.constant 0 : i32
    return %arg0, %arg1 : i32, i32
  }
}

module attributes {stable_mosaic.version = 11 : i64} {
  func.func @_linear_kernel(%arg0: i32, %arg1: i32, %arg2: i32, %arg3: memref<16x128xf32, #tpu.memory_space<vmem>>, %arg4: memref<128x256xf32, #tpu.memory_space<vmem>>, %arg5: memref<1x256xf32, #tpu.memory_space<vmem>>, %arg6: memref<16x256xf32, #tpu.memory_space<vmem>>) attributes {dimension_semantics = [#tpu.dimension_semantics<parallel>, #tpu.dimension_semantics<parallel>, #tpu.dimension_semantics<arbitrary>], iteration_bounds = array<i64: 1, 1, 1>, scalar_prefetch = 0 : i64, scratch_operands = 0 : i64, tpu.core_type = #tpu.core_type<tc>, window_params = [{transform_indices = @transform_0, window_bounds = array<i64: 16, 128>}, {transform_indices = @transform_1, window_bounds = array<i64: 128, 256>}, {transform_indices = @transform_2, window_bounds = array<i64: 1, 256>}, {transform_indices = @transform_3, window_bounds = array<i64: 16, 256>}]} {
    %c0_i32 = arith.constant 0 : i32
    %0 = arith.cmpi eq, %arg2, %c0_i32 : i32
    %1 = arith.extui %0 : i1 to i32
    %c0_i32_0 = arith.constant 0 : i32
    %2 = arith.cmpi ne, %1, %c0_i32_0 : i32
    scf.if %2 {
      %cst_10 = arith.constant 0.000000e+00 : f32
      %14 = vector.broadcast %cst_10 : f32 to vector<16x256xf32>
      %c0_11 = arith.constant 0 : index
      %c0_12 = arith.constant 0 : index
      %15 = vector.load %arg6[%c0_11, %c0_12] : memref<16x256xf32, #tpu.memory_space<vmem>>, vector<16x256xf32>
      tpu.vector_store %arg6[%c0_11, %c0_12], %14 {strides = array<i32>} : memref<16x256xf32, #tpu.memory_space<vmem>>, vector<16x256xf32>,
    } else {
    }
    %c0 = arith.constant 0 : index
    %c0_1 = arith.constant 0 : index
    %3 = vector.load %arg6[%c0, %c0_1] : memref<16x256xf32, #tpu.memory_space<vmem>>, vector<16x256xf32>
    %c0_2 = arith.constant 0 : index
    %c0_3 = arith.constant 0 : index
    %4 = vector.load %arg3[%c0_2, %c0_3] : memref<16x128xf32, #tpu.memory_space<vmem>>, vector<16x128xf32>
    %5 = arith.truncf %4 : vector<16x128xf32> to vector<16x128xbf16>
    %c0_4 = arith.constant 0 : index
    %c0_5 = arith.constant 0 : index
    %6 = vector.load %arg4[%c0_4, %c0_5] : memref<128x256xf32, #tpu.memory_space<vmem>>, vector<128x256xf32>
    %7 = arith.truncf %6 : vector<128x256xf32> to vector<128x256xbf16>
    %cst = arith.constant dense<0.000000e+00> : vector<16x256xf32>
    %8 = tpu.matmul %5, %7, %cst {dimension_numbers = #tpu.dot_dimension_numbers<[1], [0], [0], [1], [0, 0, 1, 1], [], []>} : vector<16x128xbf16>, vector<128x256xbf16>, vector<16x256xf32> -> vector<16x256xf32>
    %9 = arith.addf %3, %8 : vector<16x256xf32>
    %c0_6 = arith.constant 0 : index
    %c0_7 = arith.constant 0 : index
    %10 = vector.load %arg6[%c0_6, %c0_7] : memref<16x256xf32, #tpu.memory_space<vmem>>, vector<16x256xf32>
    tpu.vector_store %arg6[%c0_6, %c0_7], %9 {strides = array<i32>} : memref<16x256xf32, #tpu.memory_space<vmem>>, vector<16x256xf32>,
    %c0_i32_8 = arith.constant 0 : i32
    %11 = arith.cmpi eq, %arg2, %c0_i32_8 : i32
    %12 = arith.extui %11 : i1 to i32
    %c0_i32_9 = arith.constant 0 : i32
    %13 = arith.cmpi ne, %12, %c0_i32_9 : i32
    scf.if %13 {
      %c0_10 = arith.constant 0 : index
      %c0_11 = arith.constant 0 : index
      %14 = vector.load %arg6[%c0_10, %c0_11] : memref<16x256xf32, #tpu.memory_space<vmem>>, vector<16x256xf32>
      %c0_12 = arith.constant 0 : index
      %c0_13 = arith.constant 0 : index
      %15 = vector.load %arg5[%c0_12, %c0_13] : memref<1x256xf32, #tpu.memory_space<vmem>>, vector<1x256xf32>
      %16 = vector.broadcast %15 : vector<1x256xf32> to vector<16x256xf32>
      %17 = arith.addf %14, %16 : vector<16x256xf32>
      %c0_14 = arith.constant 0 : index
      %c0_15 = arith.constant 0 : index
      %18 = vector.load %arg6[%c0_14, %c0_15] : memref<16x256xf32, #tpu.memory_space<vmem>>, vector<16x256xf32>
      tpu.vector_store %arg6[%c0_14, %c0_15], %17 {strides = array<i32>} : memref<16x256xf32, #tpu.memory_space<vmem>>, vector<16x256xf32>,
    } else {
    }
    return
  }
  func.func @transform_0(%arg0: i32, %arg1: i32, %arg2: i32) -> (i32, i32) {
    %c0_i32 = arith.constant 0 : i32
    return %arg0, %arg2 : i32, i32
  }
  func.func @transform_1(%arg0: i32, %arg1: i32, %arg2: i32) -> (i32, i32) {
    %c0_i32 = arith.constant 0 : i32
    return %arg2, %arg1 : i32, i32
  }
  func.func @transform_2(%arg0: i32, %arg1: i32, %arg2: i32) -> (i32, i32) {
    %c0_i32 = arith.constant 0 : i32
    %c0_i32_0 = arith.constant 0 : i32
    return %c0_i32, %arg1 : i32, i32
  }
  func.func @transform_3(%arg0: i32, %arg1: i32, %arg2: i32) -> (i32, i32) {
    %c0_i32 = arith.constant 0 : i32
    return %arg0, %arg1 : i32, i32
  }
}

module attributes {stable_mosaic.version = 11 : i64} {
  func.func @_attention_kernel(%arg0: i32, %arg1: memref<1x8x128xf32, #tpu.memory_space<vmem>>, %arg2: memref<1x8x256xf32, #tpu.memory_space<vmem>>, %arg3: memref<1x8x8xi32, #tpu.memory_space<vmem>>, %arg4: memref<1x8x128xf32, #tpu.memory_space<vmem>>) attributes {dimension_semantics = [#tpu.dimension_semantics<parallel>], iteration_bounds = array<i64: 2>, scalar_prefetch = 0 : i64, scratch_operands = 0 : i64, tpu.core_type = #tpu.core_type<tc>, window_params = [{transform_indices = @transform_0, window_bounds = array<i64: 1, 8, 128>}, {transform_indices = @transform_1, window_bounds = array<i64: 1, 8, 256>}, {transform_indices = @transform_2, window_bounds = array<i64: 1, 8, 8>}, {transform_indices = @transform_3, window_bounds = array<i64: 1, 8, 128>}]} {
    %c0 = arith.constant 0 : index
    %c0_0 = arith.constant 0 : index
    %c0_1 = arith.constant 0 : index
    %0 = vector.load %arg1[%c0, %c0_0, %c0_1] : memref<1x8x128xf32, #tpu.memory_space<vmem>>, vector<1x8x128xf32>
    %1 = vector.shape_cast %0 : vector<1x8x128xf32> to vector<8x128xf32>
    %c0_2 = arith.constant 0 : index
    %c0_3 = arith.constant 0 : index
    %c0_4 = arith.constant 0 : index
    %2 = vector.load %arg2[%c0_2, %c0_3, %c0_4] : memref<1x8x256xf32, #tpu.memory_space<vmem>>, vector<1x8x256xf32>
    %3 = vector.shape_cast %2 : vector<1x8x256xf32> to vector<8x256xf32>
    %4 = vector.extract_strided_slice %3 {offsets = [0, 0], sizes = [8, 128], strides = [1, 1]} : vector<8x256xf32> to vector<8x128xf32>
    %5 = vector.extract_strided_slice %3 {offsets = [0, 128], sizes = [8, 128], strides = [1, 1]} : vector<8x256xf32> to vector<8x128xf32>
    %c0_5 = arith.constant 0 : index
    %c0_6 = arith.constant 0 : index
    %c0_7 = arith.constant 0 : index
    %6 = vector.load %arg3[%c0_5, %c0_6, %c0_7] : memref<1x8x8xi32, #tpu.memory_space<vmem>>, vector<1x8x8xi32>
    %7 = vector.shape_cast %6 : vector<1x8x8xi32> to vector<8x8xi32>
    %8 = vector.extract_strided_slice %1 {offsets = [0, 0], sizes = [8, 32], strides = [1, 1]} : vector<8x128xf32> to vector<8x32xf32>
    %9 = arith.truncf %8 : vector<8x32xf32> to vector<8x32xbf16>
    %10 = vector.extract_strided_slice %4 {offsets = [0, 0], sizes = [8, 32], strides = [1, 1]} : vector<8x128xf32> to vector<8x32xf32>
    %11 = arith.truncf %10 : vector<8x32xf32> to vector<8x32xbf16>
    %12 = vector.extract_strided_slice %5 {offsets = [0, 0], sizes = [8, 32], strides = [1, 1]} : vector<8x128xf32> to vector<8x32xf32>
    %13 = arith.truncf %12 : vector<8x32xf32> to vector<8x32xbf16>
    %cst = arith.constant dense<0.000000e+00> : vector<8x8xf32>
    %14 = tpu.matmul %9, %11, %cst {dimension_numbers = #tpu.dot_dimension_numbers<[1], [1], [0], [0], [0, 0, 1, 0], [], []>} : vector<8x32xbf16>, vector<8x32xbf16>, vector<8x8xf32> -> vector<8x8xf32>
    %cst_8 = arith.constant 0.176776692 : f32
    %15 = vector.broadcast %cst_8 : f32 to vector<8x8xf32>
    %16 = arith.mulf %14, %15 : vector<8x8xf32>
    %c0_i32 = arith.constant 0 : i32
    %17 = vector.broadcast %c0_i32 : i32 to vector<8x8xi32>
    %18 = arith.cmpi eq, %7, %17 : vector<8x8xi32>
    %cst_9 = arith.constant -1.000000e+09 : f32
    %19 = vector.broadcast %cst_9 : f32 to vector<8x8xf32>
    %20 = arith.select %18, %19, %16 : vector<8x8xi1>, vector<8x8xf32>
    %cst_10 = arith.constant dense<0xFF800000> : vector<8xf32>
    %21 = vector.multi_reduction <maximumf>, %20, %cst_10 [1] : vector<8x8xf32> to vector<8xf32>
    %22 = vector.shape_cast %21 : vector<8xf32> to vector<8x1xf32>
    %23 = vector.broadcast %22 : vector<8x1xf32> to vector<8x8xf32>
    %24 = arith.subf %20, %23 : vector<8x8xf32>
    %25 = math.exp %24 : vector<8x8xf32>
    %cst_11 = arith.constant dense<0.000000e+00> : vector<8xf32>
    %26 = vector.multi_reduction <add>, %25, %cst_11 [1] : vector<8x8xf32> to vector<8xf32>
    %27 = vector.shape_cast %26 : vector<8xf32> to vector<8x1xf32>
    %28 = arith.truncf %25 : vector<8x8xf32> to vector<8x8xbf16>
    %cst_12 = arith.constant dense<0.000000e+00> : vector<8x32xf32>
    %29 = tpu.matmul %28, %13, %cst_12 {dimension_numbers = #tpu.dot_dimension_numbers<[1], [0], [0], [1], [0, 0, 1, 1], [], []>} : vector<8x8xbf16>, vector<8x32xbf16>, vector<8x32xf32> -> vector<8x32xf32>
    %30 = tpu.reciprocal %27 {approx = true} : vector<8x1xf32> -> vector<8x1xf32>
    %31 = vector.broadcast %30 : vector<8x1xf32> to vector<8x32xf32>
    %32 = arith.mulf %29, %31 : vector<8x32xf32>
    %33 = vector.extract_strided_slice %1 {offsets = [0, 32], sizes = [8, 32], strides = [1, 1]} : vector<8x128xf32> to vector<8x32xf32>
    %34 = arith.truncf %33 : vector<8x32xf32> to vector<8x32xbf16>
    %35 = vector.extract_strided_slice %4 {offsets = [0, 32], sizes = [8, 32], strides = [1, 1]} : vector<8x128xf32> to vector<8x32xf32>
    %36 = arith.truncf %35 : vector<8x32xf32> to vector<8x32xbf16>
    %37 = vector.extract_strided_slice %5 {offsets = [0, 32], sizes = [8, 32], strides = [1, 1]} : vector<8x128xf32> to vector<8x32xf32>
    %38 = arith.truncf %37 : vector<8x32xf32> to vector<8x32xbf16>
    %cst_13 = arith.constant dense<0.000000e+00> : vector<8x8xf32>
    %39 = tpu.matmul %34, %36, %cst_13 {dimension_numbers = #tpu.dot_dimension_numbers<[1], [1], [0], [0], [0, 0, 1, 0], [], []>} : vector<8x32xbf16>, vector<8x32xbf16>, vector<8x8xf32> -> vector<8x8xf32>
    %cst_14 = arith.constant 0.176776692 : f32
    %40 = vector.broadcast %cst_14 : f32 to vector<8x8xf32>
    %41 = arith.mulf %39, %40 : vector<8x8xf32>
    %c0_i32_15 = arith.constant 0 : i32
    %42 = vector.broadcast %c0_i32_15 : i32 to vector<8x8xi32>
    %43 = arith.cmpi eq, %7, %42 : vector<8x8xi32>
    %cst_16 = arith.constant -1.000000e+09 : f32
    %44 = vector.broadcast %cst_16 : f32 to vector<8x8xf32>
    %45 = arith.select %43, %44, %41 : vector<8x8xi1>, vector<8x8xf32>
    %cst_17 = arith.constant dense<0xFF800000> : vector<8xf32>
    %46 = vector.multi_reduction <maximumf>, %45, %cst_17 [1] : vector<8x8xf32> to vector<8xf32>
    %47 = vector.shape_cast %46 : vector<8xf32> to vector<8x1xf32>
    %48 = vector.broadcast %47 : vector<8x1xf32> to vector<8x8xf32>
    %49 = arith.subf %45, %48 : vector<8x8xf32>
    %50 = math.exp %49 : vector<8x8xf32>
    %cst_18 = arith.constant dense<0.000000e+00> : vector<8xf32>
    %51 = vector.multi_reduction <add>, %50, %cst_18 [1] : vector<8x8xf32> to vector<8xf32>
    %52 = vector.shape_cast %51 : vector<8xf32> to vector<8x1xf32>
    %53 = arith.truncf %50 : vector<8x8xf32> to vector<8x8xbf16>
    %cst_19 = arith.constant dense<0.000000e+00> : vector<8x32xf32>
    %54 = tpu.matmul %53, %38, %cst_19 {dimension_numbers = #tpu.dot_dimension_numbers<[1], [0], [0], [1], [0, 0, 1, 1], [], []>} : vector<8x8xbf16>, vector<8x32xbf16>, vector<8x32xf32> -> vector<8x32xf32>
    %55 = tpu.reciprocal %52 {approx = true} : vector<8x1xf32> -> vector<8x1xf32>
    %56 = vector.broadcast %55 : vector<8x1xf32> to vector<8x32xf32>
    %57 = arith.mulf %54, %56 : vector<8x32xf32>
    %58 = vector.extract_strided_slice %1 {offsets = [0, 64], sizes = [8, 32], strides = [1, 1]} : vector<8x128xf32> to vector<8x32xf32>
    %59 = arith.truncf %58 : vector<8x32xf32> to vector<8x32xbf16>
    %60 = vector.extract_strided_slice %4 {offsets = [0, 64], sizes = [8, 32], strides = [1, 1]} : vector<8x128xf32> to vector<8x32xf32>
    %61 = arith.truncf %60 : vector<8x32xf32> to vector<8x32xbf16>
    %62 = vector.extract_strided_slice %5 {offsets = [0, 64], sizes = [8, 32], strides = [1, 1]} : vector<8x128xf32> to vector<8x32xf32>
    %63 = arith.truncf %62 : vector<8x32xf32> to vector<8x32xbf16>
    %cst_20 = arith.constant dense<0.000000e+00> : vector<8x8xf32>
    %64 = tpu.matmul %59, %61, %cst_20 {dimension_numbers = #tpu.dot_dimension_numbers<[1], [1], [0], [0], [0, 0, 1, 0], [], []>} : vector<8x32xbf16>, vector<8x32xbf16>, vector<8x8xf32> -> vector<8x8xf32>
    %cst_21 = arith.constant 0.176776692 : f32
    %65 = vector.broadcast %cst_21 : f32 to vector<8x8xf32>
    %66 = arith.mulf %64, %65 : vector<8x8xf32>
    %c0_i32_22 = arith.constant 0 : i32
    %67 = vector.broadcast %c0_i32_22 : i32 to vector<8x8xi32>
    %68 = arith.cmpi eq, %7, %67 : vector<8x8xi32>
    %cst_23 = arith.constant -1.000000e+09 : f32
    %69 = vector.broadcast %cst_23 : f32 to vector<8x8xf32>
    %70 = arith.select %68, %69, %66 : vector<8x8xi1>, vector<8x8xf32>
    %cst_24 = arith.constant dense<0xFF800000> : vector<8xf32>
    %71 = vector.multi_reduction <maximumf>, %70, %cst_24 [1] : vector<8x8xf32> to vector<8xf32>
    %72 = vector.shape_cast %71 : vector<8xf32> to vector<8x1xf32>
    %73 = vector.broadcast %72 : vector<8x1xf32> to vector<8x8xf32>
    %74 = arith.subf %70, %73 : vector<8x8xf32>
    %75 = math.exp %74 : vector<8x8xf32>
    %cst_25 = arith.constant dense<0.000000e+00> : vector<8xf32>
    %76 = vector.multi_reduction <add>, %75, %cst_25 [1] : vector<8x8xf32> to vector<8xf32>
    %77 = vector.shape_cast %76 : vector<8xf32> to vector<8x1xf32>
    %78 = arith.truncf %75 : vector<8x8xf32> to vector<8x8xbf16>
    %cst_26 = arith.constant dense<0.000000e+00> : vector<8x32xf32>
    %79 = tpu.matmul %78, %63, %cst_26 {dimension_numbers = #tpu.dot_dimension_numbers<[1], [0], [0], [1], [0, 0, 1, 1], [], []>} : vector<8x8xbf16>, vector<8x32xbf16>, vector<8x32xf32> -> vector<8x32xf32>
    %80 = tpu.reciprocal %77 {approx = true} : vector<8x1xf32> -> vector<8x1xf32>
    %81 = vector.broadcast %80 : vector<8x1xf32> to vector<8x32xf32>
    %82 = arith.mulf %79, %81 : vector<8x32xf32>
    %83 = vector.extract_strided_slice %1 {offsets = [0, 96], sizes = [8, 32], strides = [1, 1]} : vector<8x128xf32> to vector<8x32xf32>
    %84 = arith.truncf %83 : vector<8x32xf32> to vector<8x32xbf16>
    %85 = vector.extract_strided_slice %4 {offsets = [0, 96], sizes = [8, 32], strides = [1, 1]} : vector<8x128xf32> to vector<8x32xf32>
    %86 = arith.truncf %85 : vector<8x32xf32> to vector<8x32xbf16>
    %87 = vector.extract_strided_slice %5 {offsets = [0, 96], sizes = [8, 32], strides = [1, 1]} : vector<8x128xf32> to vector<8x32xf32>
    %88 = arith.truncf %87 : vector<8x32xf32> to vector<8x32xbf16>
    %cst_27 = arith.constant dense<0.000000e+00> : vector<8x8xf32>
    %89 = tpu.matmul %84, %86, %cst_27 {dimension_numbers = #tpu.dot_dimension_numbers<[1], [1], [0], [0], [0, 0, 1, 0], [], []>} : vector<8x32xbf16>, vector<8x32xbf16>, vector<8x8xf32> -> vector<8x8xf32>
    %cst_28 = arith.constant 0.176776692 : f32
    %90 = vector.broadcast %cst_28 : f32 to vector<8x8xf32>
    %91 = arith.mulf %89, %90 : vector<8x8xf32>
    %c0_i32_29 = arith.constant 0 : i32
    %92 = vector.broadcast %c0_i32_29 : i32 to vector<8x8xi32>
    %93 = arith.cmpi eq, %7, %92 : vector<8x8xi32>
    %cst_30 = arith.constant -1.000000e+09 : f32
    %94 = vector.broadcast %cst_30 : f32 to vector<8x8xf32>
    %95 = arith.select %93, %94, %91 : vector<8x8xi1>, vector<8x8xf32>
    %cst_31 = arith.constant dense<0xFF800000> : vector<8xf32>
    %96 = vector.multi_reduction <maximumf>, %95, %cst_31 [1] : vector<8x8xf32> to vector<8xf32>
    %97 = vector.shape_cast %96 : vector<8xf32> to vector<8x1xf32>
    %98 = vector.broadcast %97 : vector<8x1xf32> to vector<8x8xf32>
    %99 = arith.subf %95, %98 : vector<8x8xf32>
    %100 = math.exp %99 : vector<8x8xf32>
    %cst_32 = arith.constant dense<0.000000e+00> : vector<8xf32>
    %101 = vector.multi_reduction <add>, %100, %cst_32 [1] : vector<8x8xf32> to vector<8xf32>
    %102 = vector.shape_cast %101 : vector<8xf32> to vector<8x1xf32>
    %103 = arith.truncf %100 : vector<8x8xf32> to vector<8x8xbf16>
    %cst_33 = arith.constant dense<0.000000e+00> : vector<8x32xf32>
    %104 = tpu.matmul %103, %88, %cst_33 {dimension_numbers = #tpu.dot_dimension_numbers<[1], [0], [0], [1], [0, 0, 1, 1], [], []>} : vector<8x8xbf16>, vector<8x32xbf16>, vector<8x32xf32> -> vector<8x32xf32>
    %105 = tpu.reciprocal %102 {approx = true} : vector<8x1xf32> -> vector<8x1xf32>
    %106 = vector.broadcast %105 : vector<8x1xf32> to vector<8x32xf32>
    %107 = arith.mulf %104, %106 : vector<8x32xf32>
    %108 = tpu.concatenate %32, %57, %82, %107 in 1 : vector<8x32xf32>, vector<8x32xf32>, vector<8x32xf32>, vector<8x32xf32> -> vector<8x128xf32>
    %c0_34 = arith.constant 0 : index
    %c0_35 = arith.constant 0 : index
    %c0_36 = arith.constant 0 : index
    %109 = vector.load %arg4[%c0_34, %c0_35, %c0_36] : memref<1x8x128xf32, #tpu.memory_space<vmem>>, vector<1x8x128xf32>
    %110 = vector.shape_cast %109 : vector<1x8x128xf32> to vector<8x128xf32>
    %111 = vector.shape_cast %108 : vector<8x128xf32> to vector<1x8x128xf32>
    tpu.vector_store %arg4[%c0_34, %c0_35, %c0_36], %111 {strides = array<i32>} : memref<1x8x128xf32, #tpu.memory_space<vmem>>, vector<1x8x128xf32>,
    return
  }
  func.func @transform_0(%arg0: i32) -> (i32, i32, i32) {
    %c0_i32 = arith.constant 0 : i32
    %c0_i32_0 = arith.constant 0 : i32
    %c0_i32_1 = arith.constant 0 : i32
    return %arg0, %c0_i32, %c0_i32_0 : i32, i32, i32
  }
  func.func @transform_1(%arg0: i32) -> (i32, i32, i32) {
    %c0_i32 = arith.constant 0 : i32
    %c0_i32_0 = arith.constant 0 : i32
    %c0_i32_1 = arith.constant 0 : i32
    return %arg0, %c0_i32, %c0_i32_0 : i32, i32, i32
  }
  func.func @transform_2(%arg0: i32) -> (i32, i32, i32) {
    %c0_i32 = arith.constant 0 : i32
    %c0_i32_0 = arith.constant 0 : i32
    %c0_i32_1 = arith.constant 0 : i32
    return %arg0, %c0_i32, %c0_i32_0 : i32, i32, i32
  }
  func.func @transform_3(%arg0: i32) -> (i32, i32, i32) {
    %c0_i32 = arith.constant 0 : i32
    %c0_i32_0 = arith.constant 0 : i32
    %c0_i32_1 = arith.constant 0 : i32
    return %arg0, %c0_i32, %c0_i32_0 : i32, i32, i32
  }
}

module attributes {stable_mosaic.version = 11 : i64} {
  func.func @_linear_kernel(%arg0: i32, %arg1: i32, %arg2: i32, %arg3: memref<16x128xf32, #tpu.memory_space<vmem>>, %arg4: memref<128x256xf32, #tpu.memory_space<vmem>>, %arg5: memref<1x256xf32, #tpu.memory_space<vmem>>, %arg6: memref<16x256xf32, #tpu.memory_space<vmem>>) attributes {dimension_semantics = [#tpu.dimension_semantics<parallel>, #tpu.dimension_semantics<parallel>, #tpu.dimension_semantics<arbitrary>], iteration_bounds = array<i64: 1, 1, 1>, scalar_prefetch = 0 : i64, scratch_operands = 0 : i64, tpu.core_type = #tpu.core_type<tc>, window_params = [{transform_indices = @transform_0, window_bounds = array<i64: 16, 128>}, {transform_indices = @transform_1, window_bounds = array<i64: 128, 256>}, {transform_indices = @transform_2, window_bounds = array<i64: 1, 256>}, {transform_indices = @transform_3, window_bounds = array<i64: 16, 256>}]} {
    %c0_i32 = arith.constant 0 : i32
    %0 = arith.cmpi eq, %arg2, %c0_i32 : i32
    %1 = arith.extui %0 : i1 to i32
    %c0_i32_0 = arith.constant 0 : i32
    %2 = arith.cmpi ne, %1, %c0_i32_0 : i32
    scf.if %2 {
      %cst_10 = arith.constant 0.000000e+00 : f32
      %14 = vector.broadcast %cst_10 : f32 to vector<16x256xf32>
      %c0_11 = arith.constant 0 : index
      %c0_12 = arith.constant 0 : index
      %15 = vector.load %arg6[%c0_11, %c0_12] : memref<16x256xf32, #tpu.memory_space<vmem>>, vector<16x256xf32>
      tpu.vector_store %arg6[%c0_11, %c0_12], %14 {strides = array<i32>} : memref<16x256xf32, #tpu.memory_space<vmem>>, vector<16x256xf32>,
    } else {
    }
    %c0 = arith.constant 0 : index
    %c0_1 = arith.constant 0 : index
    %3 = vector.load %arg6[%c0, %c0_1] : memref<16x256xf32, #tpu.memory_space<vmem>>, vector<16x256xf32>
    %c0_2 = arith.constant 0 : index
    %c0_3 = arith.constant 0 : index
    %4 = vector.load %arg3[%c0_2, %c0_3] : memref<16x128xf32, #tpu.memory_space<vmem>>, vector<16x128xf32>
    %5 = arith.truncf %4 : vector<16x128xf32> to vector<16x128xbf16>
    %c0_4 = arith.constant 0 : index
    %c0_5 = arith.constant 0 : index
    %6 = vector.load %arg4[%c0_4, %c0_5] : memref<128x256xf32, #tpu.memory_space<vmem>>, vector<128x256xf32>
    %7 = arith.truncf %6 : vector<128x256xf32> to vector<128x256xbf16>
    %cst = arith.constant dense<0.000000e+00> : vector<16x256xf32>
    %8 = tpu.matmul %5, %7, %cst {dimension_numbers = #tpu.dot_dimension_numbers<[1], [0], [0], [1], [0, 0, 1, 1], [], []>} : vector<16x128xbf16>, vector<128x256xbf16>, vector<16x256xf32> -> vector<16x256xf32>
    %9 = arith.addf %3, %8 : vector<16x256xf32>
    %c0_6 = arith.constant 0 : index
    %c0_7 = arith.constant 0 : index
    %10 = vector.load %arg6[%c0_6, %c0_7] : memref<16x256xf32, #tpu.memory_space<vmem>>, vector<16x256xf32>
    tpu.vector_store %arg6[%c0_6, %c0_7], %9 {strides = array<i32>} : memref<16x256xf32, #tpu.memory_space<vmem>>, vector<16x256xf32>,
    %c0_i32_8 = arith.constant 0 : i32
    %11 = arith.cmpi eq, %arg2, %c0_i32_8 : i32
    %12 = arith.extui %11 : i1 to i32
    %c0_i32_9 = arith.constant 0 : i32
    %13 = arith.cmpi ne, %12, %c0_i32_9 : i32
    scf.if %13 {
      %c0_10 = arith.constant 0 : index
      %c0_11 = arith.constant 0 : index
      %14 = vector.load %arg6[%c0_10, %c0_11] : memref<16x256xf32, #tpu.memory_space<vmem>>, vector<16x256xf32>
      %c0_12 = arith.constant 0 : index
      %c0_13 = arith.constant 0 : index
      %15 = vector.load %arg5[%c0_12, %c0_13] : memref<1x256xf32, #tpu.memory_space<vmem>>, vector<1x256xf32>
      %16 = vector.broadcast %15 : vector<1x256xf32> to vector<16x256xf32>
      %17 = arith.addf %14, %16 : vector<16x256xf32>
      %cst_14 = arith.constant 0.000000e+00 : f32
      %18 = vector.broadcast %cst_14 : f32 to vector<16x256xf32>
      %19 = arith.maximumf %17, %18 : vector<16x256xf32>
      %c0_15 = arith.constant 0 : index
      %c0_16 = arith.constant 0 : index
      %20 = vector.load %arg6[%c0_15, %c0_16] : memref<16x256xf32, #tpu.memory_space<vmem>>, vector<16x256xf32>
      tpu.vector_store %arg6[%c0_15, %c0_16], %19 {strides = array<i32>} : memref<16x256xf32, #tpu.memory_space<vmem>>, vector<16x256xf32>,
    } else {
    }
    return
  }
  func.func @transform_0(%arg0: i32, %arg1: i32, %arg2: i32) -> (i32, i32) {
    %c0_i32 = arith.constant 0 : i32
    return %arg0, %arg2 : i32, i32
  }
  func.func @transform_1(%arg0: i32, %arg1: i32, %arg2: i32) -> (i32, i32) {
    %c0_i32 = arith.constant 0 : i32
    return %arg2, %arg1 : i32, i32
  }
  func.func @transform_2(%arg0: i32, %arg1: i32, %arg2: i32) -> (i32, i32) {
    %c0_i32 = arith.constant 0 : i32
    %c0_i32_0 = arith.constant 0 : i32
    return %c0_i32, %arg1 : i32, i32
  }
  func.func @transform_3(%arg0: i32, %arg1: i32, %arg2: i32) -> (i32, i32) {
    %c0_i32 = arith.constant 0 : i32
    return %arg0, %arg1 : i32, i32
  }
}

module attributes {stable_mosaic.version = 11 : i64} {
  func.func @_linear_kernel(%arg0: i32, %arg1: i32, %arg2: i32, %arg3: memref<16x256xf32, #tpu.memory_space<vmem>>, %arg4: memref<256x128xf32, #tpu.memory_space<vmem>>, %arg5: memref<1x128xf32, #tpu.memory_space<vmem>>, %arg6: memref<16x128xf32, #tpu.memory_space<vmem>>, %arg7: memref<16x128xf32, #tpu.memory_space<vmem>>) attributes {dimension_semantics = [#tpu.dimension_semantics<parallel>, #tpu.dimension_semantics<parallel>, #tpu.dimension_semantics<arbitrary>], iteration_bounds = array<i64: 1, 1, 1>, scalar_prefetch = 0 : i64, scratch_operands = 0 : i64, tpu.core_type = #tpu.core_type<tc>, window_params = [{transform_indices = @transform_0, window_bounds = array<i64: 16, 256>}, {transform_indices = @transform_1, window_bounds = array<i64: 256, 128>}, {transform_indices = @transform_2, window_bounds = array<i64: 1, 128>}, {transform_indices = @transform_3, window_bounds = array<i64: 16, 128>}, {transform_indices = @transform_4, window_bounds = array<i64: 16, 128>}]} {
    %c0_i32 = arith.constant 0 : i32
    %0 = arith.cmpi eq, %arg2, %c0_i32 : i32
    %1 = arith.extui %0 : i1 to i32
    %c0_i32_0 = arith.constant 0 : i32
    %2 = arith.cmpi ne, %1, %c0_i32_0 : i32
    scf.if %2 {
      %cst_10 = arith.constant 0.000000e+00 : f32
      %14 = vector.broadcast %cst_10 : f32 to vector<16x128xf32>
      %c0_11 = arith.constant 0 : index
      %c0_12 = arith.constant 0 : index
      %15 = vector.load %arg7[%c0_11, %c0_12] : memref<16x128xf32, #tpu.memory_space<vmem>>, vector<16x128xf32>
      tpu.vector_store %arg7[%c0_11, %c0_12], %14 {strides = array<i32>} : memref<16x128xf32, #tpu.memory_space<vmem>>, vector<16x128xf32>,
    } else {
    }
    %c0 = arith.constant 0 : index
    %c0_1 = arith.constant 0 : index
    %3 = vector.load %arg7[%c0, %c0_1] : memref<16x128xf32, #tpu.memory_space<vmem>>, vector<16x128xf32>
    %c0_2 = arith.constant 0 : index
    %c0_3 = arith.constant 0 : index
    %4 = vector.load %arg3[%c0_2, %c0_3] : memref<16x256xf32, #tpu.memory_space<vmem>>, vector<16x256xf32>
    %5 = arith.truncf %4 : vector<16x256xf32> to vector<16x256xbf16>
    %c0_4 = arith.constant 0 : index
    %c0_5 = arith.constant 0 : index
    %6 = vector.load %arg4[%c0_4, %c0_5] : memref<256x128xf32, #tpu.memory_space<vmem>>, vector<256x128xf32>
    %7 = arith.truncf %6 : vector<256x128xf32> to vector<256x128xbf16>
    %cst = arith.constant dense<0.000000e+00> : vector<16x128xf32>
    %8 = tpu.matmul %5, %7, %cst {dimension_numbers = #tpu.dot_dimension_numbers<[1], [0], [0], [1], [0, 0, 1, 1], [], []>} : vector<16x256xbf16>, vector<256x128xbf16>, vector<16x128xf32> -> vector<16x128xf32>
    %9 = arith.addf %3, %8 : vector<16x128xf32>
    %c0_6 = arith.constant 0 : index
    %c0_7 = arith.constant 0 : index
    %10 = vector.load %arg7[%c0_6, %c0_7] : memref<16x128xf32, #tpu.memory_space<vmem>>, vector<16x128xf32>
    tpu.vector_store %arg7[%c0_6, %c0_7], %9 {strides = array<i32>} : memref<16x128xf32, #tpu.memory_space<vmem>>, vector<16x128xf32>,
    %c0_i32_8 = arith.constant 0 : i32
    %11 = arith.cmpi eq, %arg2, %c0_i32_8 : i32
    %12 = arith.extui %11 : i1 to i32
    %c0_i32_9 = arith.constant 0 : i32
    %13 = arith.cmpi ne, %12, %c0_i32_9 : i32
    scf.if %13 {
      %c0_10 = arith.constant 0 : index
      %c0_11 = arith.constant 0 : index
      %14 = vector.load %arg7[%c0_10, %c0_11] : memref<16x128xf32, #tpu.memory_space<vmem>>, vector<16x128xf32>
      %c0_12 = arith.constant 0 : index
      %c0_13 = arith.constant 0 : index
      %15 = vector.load %arg5[%c0_12, %c0_13] : memref<1x128xf32, #tpu.memory_space<vmem>>, vector<1x128xf32>
      %16 = vector.broadcast %15 : vector<1x128xf32> to vector<16x128xf32>
      %17 = arith.addf %14, %16 : vector<16x128xf32>
      %c0_14 = arith.constant 0 : index
      %c0_15 = arith.constant 0 : index
      %18 = vector.load %arg6[%c0_14, %c0_15] : memref<16x128xf32, #tpu.memory_space<vmem>>, vector<16x128xf32>
      %19 = arith.addf %17, %18 : vector<16x128xf32>
      %c0_16 = arith.constant 0 : index
      %c0_17 = arith.constant 0 : index
      %20 = vector.load %arg7[%c0_16, %c0_17] : memref<16x128xf32, #tpu.memory_space<vmem>>, vector<16x128xf32>
      tpu.vector_store %arg7[%c0_16, %c0_17], %19 {strides = array<i32>} : memref<16x128xf32, #tpu.memory_space<vmem>>, vector<16x128xf32>,
    } else {
    }
    return
  }
  func.func @transform_0(%arg0: i32, %arg1: i32, %arg2: i32) -> (i32, i32) {
    %c0_i32 = arith.constant 0 : i32
    return %arg0, %arg2 : i32, i32
  }
  func.func @transform_1(%arg0: i32, %arg1: i32, %arg2: i32) -> (i32, i32) {
    %c0_i32 = arith.constant 0 : i32
    return %arg2, %arg1 : i32, i32
  }
  func.func @transform_2(%arg0: i32, %arg1: i32, %arg2: i32) -> (i32, i32) {
    %c0_i32 = arith.constant 0 : i32
    %c0_i32_0 = arith.constant 0 : i32
    return %c0_i32, %arg1 : i32, i32
  }
  func.func @transform_3(%arg0: i32, %arg1: i32, %arg2: i32) -> (i32, i32) {
    %c0_i32 = arith.constant 0 : i32
    return %arg0, %arg1 : i32, i32
  }
  func.func @transform_4(%arg0: i32, %arg1: i32, %arg2: i32) -> (i32, i32) {
    %c0_i32 = arith.constant 0 : i32
    return %arg0, %arg1 : i32, i32
  }
}

</mosaic_0001>

<bundles_post_ra>
// kernel: decoder_layer.12
= control target key start
LH: loop header
LB: loop body
LE: loop exit
PB: predicated region body
PF: predicated region fallthrough
CT: control target
= control target key end

     0   :  { %s108_s0 = inlined_call_operand.vmem [shape: f32[16,128], index: 0, kind: input, shape index: {}]   ;;  %s109_s1 = inlined_call_operand.vmem [shape: f32[1,128], index: 1, kind: input, shape index: {}]   ;;  %s110_s2 = inlined_call_operand.vmem [shape: f32[1,128], index: 2, kind: input, shape index: {}]   ;;  %s111_s3 = inlined_call_operand.vmem [shape: f32[16,128], index: 3, kind: output, shape index: {}]  }
   0x1   :  { %v14_v0 = vld [vmem:[%s108_s0] sm:$0xff]  ;;  %v15_v1 = vld [vmem:[%s108_s0 + $0x8] sm:$0xff] }
   0x2   :  { %16 = vadd.xlane.f32.xlu0 %v14_v0  ;;  %v64_v16 = vld [vmem:[%s109_s1] ss:$0 sm:$0xff] }
   0x3   :  { %v65_v19 = vld [vmem:[%s110_s2] ss:$0 sm:$0xff] }
   0x6   :  { %18 = vadd.xlane.f32.xlu0 %v15_v1 }
  0x8f   :  { %v17_v2 = vpop.xlane.xlu0 %16 }
  0x90   :  { %v21_v3 = vmul.f32 0.0078125, %v17_v2 }
  0x92   :  { %v23_v4 = vsub.f32 %v14_v0, %v21_v3 }
  0x93   :  { %v19_v5 = vpop.xlane.xlu0 %18 }
  0x94   :  { %v22_v6 = vmul.f32 0.0078125, %v19_v5  ;;  %v25_v7 = vmul.f32 %v23_v4, %v23_v4 }
  0x96   :  { %v24_v8 = vsub.f32 %v15_v1, %v22_v6  ;;  %27 = vadd.xlane.f32.xlu1 %v25_v7 }
  0x98   :  { %v26_v9 = vmul.f32 %v24_v8, %v24_v8 }
  0x9a   :  { %29 = vadd.xlane.f32.xlu1 %v26_v9 }
 0x123   :  { %v28_v10 = vpop.xlane.xlu1 %27 }
 0x124   :  { %v32_v11 = vmul.f32 0.007874016, %v28_v10 }
 0x126   :  { %66 = vrsqrt.f32 %v32_v11 }
 0x127   :  { %v30_v12 = vpop.xlane.xlu1 %29 }
 0x128   :  { %v33_v13 = vmul.f32 0.007874016, %v30_v12 }
 0x12a   :  { %68 = vrsqrt.f32 %v33_v13 }
 0x130   :  { %v67_v14 = vpop.eup %66 }
 0x131   :  { %v36_v15 = vmul.f32 %v67_v14, %v23_v4 }
 0x133   :  { %v38_v17 = vadd.f32 1e-06, %v36_v15 }
 0x134   :  { %v69_v18 = vpop.eup %68 }
 0x135   :  { %v48_v20 = vmul.f32 %v64_v16, %v38_v17  ;;  %v37_v21 = vmul.f32 %v69_v18, %v24_v8 }
 0x137   :  { %v56_v22 = vadd.f32 %v65_v19, %v48_v20  ;;  %v39_v23 = vadd.f32 1e-06, %v37_v21 }
 0x139   :  { %58 = vst [vmem:[%s111_s3] sm:$0xff] %v56_v22  ;;  %v49_v24 = vmul.f32 %v64_v16, %v39_v23 }
 0x13b   :  { %v57_v25 = vadd.f32 %v65_v19, %v49_v24 }
 0x13d   :  { %59 = vst [vmem:[%s111_s3 + $0x8] sm:$0xff] %v57_v25 }

// kernel: decoder_layer.15
= control target key start
LH: loop header
LB: loop body
LE: loop exit
PB: predicated region body
PF: predicated region fallthrough
CT: control target
= control target key end

     0   :  { %v154_v0 = vmov 0.0   ;;  %vm155_vm0 = vmmov 0   ;;  %s250_s1 = inlined_call_operand.vmem [shape: f32[128,128], index: 1, kind: input, shape index: {}]   ;;  %s251_s0 = inlined_call_operand.vmem [shape: f32[16,128], index: 0, kind: input, shape index: {}]   ;;  %s252_s2 = inlined_call_operand.vmem [shape: f32[1,128], index: 2, kind: input, shape index: {}]   ;;  %s253_s3 = inlined_call_operand.vmem [shape: f32[16,128], index: 3, kind: input, shape index: {}]   ;;  %s254_s4 = inlined_call_operand.vmem [shape: f32[16,128], index: 4, kind: output, shape index: {}]  }
   0x1   :  { %132 = vmatprep.subr.bf16.mxu0 %v154_v0  ;;  %v29_v1 = vld [vmem:[%s250_s1] sm:$0xff]  ;;  %v30_v2 = vld [vmem:[%s250_s1 + $0x8] sm:$0xff]  ;;  %v31_v3 = vld [vmem:[%s250_s1 + $0x10] sm:$0xff]  ;;  %148 = vmatprep.mubr.msk.bf16.mxu0 %vm155_vm0, %v154_v0 }
   0x2   :  { %v45_v4 = vpack.c.bf16 %v30_v2, %v29_v1  ;;  %v32_v5 = vld [vmem:[%s250_s1 + $0x18] sm:$0xff]  ;;  %v33_v7 = vld [vmem:[%s250_s1 + $0x20] sm:$0xff]  ;;  %v34_v8 = vld [vmem:[%s250_s1 + $0x28] sm:$0xff] }
   0x3   :  { %v46_v6 = vpack.c.bf16 %v32_v5, %v31_v3  ;;  %v47_v9 = vpack.c.bf16 %v34_v8, %v33_v7  ;;  %v35_v10 = vld [vmem:[%s250_s1 + $0x30] sm:$0xff]  ;;  %v36_v11 = vld [vmem:[%s250_s1 + $0x38] sm:$0xff]  ;;  %v37_v13 = vld [vmem:[%s250_s1 + $0x40] sm:$0xff] }
   0x4   :  { %133 = vmatpush3.bf16.msra.mxu0 %v45_v4  ;;  %v48_v12 = vpack.c.bf16 %v36_v11, %v35_v10  ;;  %v38_v14 = vld [vmem:[%s250_s1 + $0x48] sm:$0xff]  ;;  %v39_v16 = vld [vmem:[%s250_s1 + $0x50] sm:$0xff]  ;;  %v40_v17 = vld [vmem:[%s250_s1 + $0x58] sm:$0xff] }
   0x5   :  { %134 = vmatprep.subr.bf16.mxu0 %v154_v0  ;;  %v49_v15 = vpack.c.bf16 %v38_v14, %v37_v13  ;;  %v50_v18 = vpack.c.bf16 %v40_v17, %v39_v16  ;;  %v41_v19 = vld [vmem:[%s250_s1 + $0x60] sm:$0xff]  ;;  %v42_v20 = vld [vmem:[%s250_s1 + $0x68] sm:$0xff]  ;;  %v43_v22 = vld [vmem:[%s250_s1 + $0x70] sm:$0xff] }
   0x6   :  { %v51_v21 = vpack.c.bf16 %v42_v20, %v41_v19  ;;  %v44_v23 = vld [vmem:[%s250_s1 + $0x78] sm:$0xff]  ;;  %v26_v25 = vld [vmem:[%s251_s0] sm:$0xff]  ;;  %v27_v26 = vld [vmem:[%s251_s0 + $0x8] sm:$0xff] }
   0x7   :  { %v52_v24 = vpack.c.bf16 %v44_v23, %v43_v22  ;;  %v28_v27 = vpack.c.bf16 %v27_v26, %v26_v25  ;;  %v122_v29 = vld [vmem:[%s252_s2] ss:$0 sm:$0xff]  ;;  %v113_v35 = vld [vmem:[%s253_s3 + $0x8] sm:$0xff] }
   0x8   :  { %135 = vmatpush3.bf16.msra.mxu0 %v46_v6  ;;  %v112_v31 = vld [vmem:[%s253_s3] sm:$0xff] }
   0x9   :  { %136 = vmatprep.subr.bf16.mxu0 %v154_v0 }
   0xc   :  { %137 = vmatpush3.bf16.msra.mxu0 %v47_v9 }
   0xd   :  { %138 = vmatprep.subr.bf16.mxu0 %v154_v0 }
  0x10   :  { %139 = vmatpush3.bf16.msra.mxu0 %v48_v12 }
  0x11   :  { %140 = vmatprep.subr.bf16.mxu0 %v154_v0 }
  0x14   :  { %141 = vmatpush3.bf16.msra.mxu0 %v49_v15 }
  0x15   :  { %142 = vmatprep.subr.bf16.mxu0 %v154_v0 }
  0x18   :  { %143 = vmatpush3.bf16.msra.mxu0 %v50_v18 }
  0x19   :  { %144 = vmatprep.subr.bf16.mxu0 %v154_v0 }
  0x1c   :  { %145 = vmatpush3.bf16.msra.mxu0 %v51_v21 }
  0x1d   :  { %146 = vmatprep.subr.bf16.mxu0 %v154_v0 }
  0x20   :  { %147 = vmatpush3.bf16.msra.mxu0 %v52_v24 }
  0x23   :  { %149 = vmatmul.mubr.bf16.vlgmr.msra.gmra.mrb[0].mxu0 %v28_v27 }
  0xf6   :  { %v87_v28 = vpop.f32.mrb[0].mxu0 }
  0xf7   :  { %v150_v30 = vpop.f32.mrb[1].mxu0  ;;  %v110_v33 = vadd.f32 %v122_v29, %v87_v28 }
  0xf8   :  { %v90_v32 = vpop.f32.mrb[2].mxu0 }
  0xf9   :  { %v151_v34 = vpop.f32.mrb[3].mxu0  ;;  %v114_v36 = vadd.f32 %v112_v31, %v110_v33  ;;  %v111_v37 = vadd.f32 %v122_v29, %v90_v32 }
  0xfb   :  { %116 = vst [vmem:[%s254_s4] sm:$0xff] %v114_v36  ;;  %v115_v38 = vadd.f32 %v113_v35, %v111_v37 }
  0xfd   :  { %117 = vst [vmem:[%s254_s4 + $0x8] sm:$0xff] %v115_v38 }

// kernel: decoder_layer.13
= control target key start
LH: loop header
LB: loop body
LE: loop exit
PB: predicated region body
PF: predicated region fallthrough
CT: control target
= control target key end

     0   :  { %v276_v0 = vmov 0.0   ;;  %vm277_vm0 = vmmov 0   ;;  %v278_v8 = vmov 0   ;;  %s479_s1 = inlined_call_operand.vmem [shape: f32[128,384], index: 1, kind: input, shape index: {}]   ;;  %s480_s0 = inlined_call_operand.vmem [shape: f32[16,128], index: 0, kind: input, shape index: {}]   ;;  %s481_s2 = inlined_call_operand.vmem [shape: f32[1,384], index: 2, kind: input, shape index: {}]   ;;  %s482_s3 = inlined_call_operand.vmem [shape: f32[16,384], index: 3, kind: output, shape index: {}]  }
   0x1   :  { %253 = vmatprep.subr.bf16.mxu1 %v276_v0  ;;  %v35_v1 = vld [vmem:[%s479_s1 + $0x8] sm:$0xff]  ;;  %v38_v2 = vld [vmem:[%s479_s1 + $0x20] sm:$0xff]  ;;  %v36_v3 = vld [vmem:[%s479_s1 + $0x10] sm:$0xff]  ;;  %269 = vmatprep.mubr.msk.bf16.mxu1 %vm277_vm0, %v276_v0 }
   0x2   :  { %v83_v4 = vpack.c.bf16 %v38_v2, %v35_v1  ;;  %v39_v5 = vld [vmem:[%s479_s1 + $0x28] sm:$0xff]  ;;  %v34_v6 = vld [vmem:[%s479_s1] sm:$0xff]  ;;  %v37_v7 = vld [vmem:[%s479_s1 + $0x18] sm:$0xff]  ;;  %138 = vmatprep.mubr.bf16.mxu0 %v278_v8 }
   0x3   :  { %v84_v9 = vpack.c.bf16 %v39_v5, %v36_v3  ;;  %v82_v10 = vpack.c.bf16 %v37_v7, %v34_v6  ;;  %v41_v11 = vld [vmem:[%s479_s1 + $0x38] sm:$0xff]  ;;  %v44_v12 = vld [vmem:[%s479_s1 + $0x50] sm:$0xff]  ;;  %v42_v13 = vld [vmem:[%s479_s1 + $0x40] sm:$0xff] }
   0x4   :  { %106 = vmatprep.subr.bf16.mxu0 %v83_v4  ;;  %v86_v14 = vpack.c.bf16 %v44_v12, %v41_v11  ;;  %v45_v15 = vld [vmem:[%s479_s1 + $0x58] sm:$0xff]  ;;  %v40_v16 = vld [vmem:[%s479_s1 + $0x30] sm:$0xff]  ;;  %v43_v17 = vld [vmem:[%s479_s1 + $0x48] sm:$0xff] }
   0x5   :  { %254 = vmatpush3.bf16.msra.mxu1 %v84_v9  ;;  %107 = vmatpush1.bf16.msra.mxu0 %v82_v10  ;;  %v87_v18 = vpack.c.bf16 %v45_v15, %v42_v13  ;;  %v85_v19 = vpack.c.bf16 %v43_v17, %v40_v16  ;;  %v47_v20 = vld [vmem:[%s479_s1 + $0x68] sm:$0xff]  ;;  %v50_v21 = vld [vmem:[%s479_s1 + $0x80] sm:$0xff]  ;;  %v48_v22 = vld [vmem:[%s479_s1 + $0x70] sm:$0xff] }
   0x6   :  { %255 = vmatprep.subr.bf16.mxu1 %v276_v0  ;;  %108 = vmatprep.subr.bf16.mxu0 %v86_v14  ;;  %v89_v23 = vpack.c.bf16 %v50_v21, %v47_v20  ;;  %v51_v24 = vld [vmem:[%s479_s1 + $0x88] sm:$0xff]  ;;  %v46_v25 = vld [vmem:[%s479_s1 + $0x60] sm:$0xff]  ;;  %v49_v26 = vld [vmem:[%s479_s1 + $0x78] sm:$0xff]  ;;  %v213_v14 = vlaneseq }
   0x7   :  { %v53_v27 = vld [vmem:[%s479_s1 + $0x98] sm:$0xff]  ;;  %v56_v28 = vld [vmem:[%s479_s1 + $0xb0] sm:$0xff]  ;;  %v90_v29 = vpack.c.bf16 %v51_v24, %v48_v22  ;;  %v88_v30 = vpack.c.bf16 %v49_v26, %v46_v25  ;;  %v54_v31 = vld [vmem:[%s479_s1 + $0xa0] sm:$0xff] }
   0x8   :  { %v92_v32 = vpack.c.bf16 %v56_v28, %v53_v27  ;;  %v57_v33 = vld [vmem:[%s479_s1 + $0xb8] sm:$0xff]  ;;  %v52_v34 = vld [vmem:[%s479_s1 + $0x90] sm:$0xff]  ;;  %v55_v35 = vld [vmem:[%s479_s1 + $0xa8] sm:$0xff]  ;;  %v214_v15 = vshrl.u32 %v213_v14, 7 }
   0x9   :  { %256 = vmatpush3.bf16.msra.mxu1 %v87_v18  ;;  %109 = vmatpush1.bf16.msra.mxu0 %v85_v19  ;;  %v59_v36 = vld [vmem:[%s479_s1 + $0xc8] sm:$0xff]  ;;  %v62_v37 = vld [vmem:[%s479_s1 + $0xe0] sm:$0xff]  ;;  %v93_v38 = vpack.c.bf16 %v57_v33, %v54_v31  ;;  %v91_v39 = vpack.c.bf16 %v55_v35, %v52_v34  ;;  %v60_v40 = vld [vmem:[%s479_s1 + $0xd0] sm:$0xff] }
   0xa   :  { %257 = vmatprep.subr.bf16.mxu1 %v276_v0  ;;  %110 = vmatprep.subr.bf16.mxu0 %v89_v23  ;;  %v95_v41 = vpack.c.bf16 %v62_v37, %v59_v36  ;;  %v63_v42 = vld [vmem:[%s479_s1 + $0xe8] sm:$0xff]  ;;  %v58_v43 = vld [vmem:[%s479_s1 + $0xc0] sm:$0xff]  ;;  %v61_v44 = vld [vmem:[%s479_s1 + $0xd8] sm:$0xff]  ;;  %v223_v16 = vsub.s32 2, %v214_v15  ;;  %v215_v17 = vsub.s32 0, %v214_v15  ;;  %v219_v19 = vsub.s32 1, %v214_v15 }
   0xb   :  { %v65_v45 = vld [vmem:[%s479_s1 + $0xf8] sm:$0xff]  ;;  %v68_v46 = vld [vmem:[%s479_s1 + $0x110] sm:$0xff]  ;;  %v96_v47 = vpack.c.bf16 %v63_v42, %v60_v40  ;;  %v94_v48 = vpack.c.bf16 %v61_v44, %v58_v43  ;;  %v66_v49 = vld [vmem:[%s479_s1 + $0x100] sm:$0xff] }
   0xc   :  { %v98_v50 = vpack.c.bf16 %v68_v46, %v65_v45  ;;  %v69_v51 = vld [vmem:[%s479_s1 + $0x118] sm:$0xff]  ;;  %v64_v52 = vld [vmem:[%s479_s1 + $0xf0] sm:$0xff]  ;;  %v67_v53 = vld [vmem:[%s479_s1 + $0x108] sm:$0xff] }
   0xd   :  { %258 = vmatpush3.bf16.msra.mxu1 %v90_v29  ;;  %111 = vmatpush1.bf16.msra.mxu0 %v88_v30  ;;  %v71_v54 = vld [vmem:[%s479_s1 + $0x128] sm:$0xff]  ;;  %v74_v55 = vld [vmem:[%s479_s1 + $0x140] sm:$0xff]  ;;  %v99_v56 = vpack.c.bf16 %v69_v51, %v66_v49  ;;  %v97_v57 = vpack.c.bf16 %v67_v53, %v64_v52  ;;  %v72_v58 = vld [vmem:[%s479_s1 + $0x130] sm:$0xff] }
   0xe   :  { %259 = vmatprep.subr.bf16.mxu1 %v276_v0  ;;  %112 = vmatprep.subr.bf16.mxu0 %v92_v32  ;;  %v101_v59 = vpack.c.bf16 %v74_v55, %v71_v54  ;;  %v75_v60 = vld [vmem:[%s479_s1 + $0x148] sm:$0xff]  ;;  %v70_v61 = vld [vmem:[%s479_s1 + $0x120] sm:$0xff]  ;;  %v73_v62 = vld [vmem:[%s479_s1 + $0x138] sm:$0xff] }
   0xf   :  { %v77_v63 = vld [vmem:[%s479_s1 + $0x158] sm:$0xff]  ;;  %v80_v1 = vld [vmem:[%s479_s1 + $0x170] sm:$0xff]  ;;  %v102_v2 = vpack.c.bf16 %v75_v60, %v72_v58  ;;  %v100_v3 = vpack.c.bf16 %v73_v62, %v70_v61  ;;  %v78_v4 = vld [vmem:[%s479_s1 + $0x160] sm:$0xff] }
  0x10   :  { %v104_v5 = vpack.c.bf16 %v80_v1, %v77_v63  ;;  %v81_v6 = vld [vmem:[%s479_s1 + $0x178] sm:$0xff]  ;;  %v76_v7 = vld [vmem:[%s479_s1 + $0x150] sm:$0xff]  ;;  %v79_v8 = vld [vmem:[%s479_s1 + $0x168] sm:$0xff] }
  0x11   :  { %260 = vmatpush3.bf16.msra.mxu1 %v93_v38  ;;  %113 = vmatpush1.bf16.msra.mxu0 %v91_v39  ;;  %v105_v9 = vpack.c.bf16 %v81_v6, %v78_v4  ;;  %v103_v10 = vpack.c.bf16 %v79_v8, %v76_v7  ;;  %v31_v11 = vld [vmem:[%s480_s0] sm:$0xff]  ;;  %v32_v12 = vld [vmem:[%s480_s0 + $0x8] sm:$0xff] }
  0x12   :  { %261 = vmatprep.subr.bf16.mxu1 %v276_v0  ;;  %114 = vmatprep.subr.bf16.mxu0 %v95_v41  ;;  %v33_v13 = vpack.c.bf16 %v32_v12, %v31_v11  ;;  %v211_v18 = vld [vmem:[%s481_s2] sm:$0x7] }
  0x13   :  { %v224_v20 = vrot.slane %v211_v18, %v223_v16  ;;  %v216_v21 = vrot.slane %v211_v18, %v215_v17 }
  0x15   :  { %262 = vmatpush3.bf16.msra.mxu1 %v96_v47  ;;  %115 = vmatpush1.bf16.msra.mxu0 %v94_v48 }
  0x16   :  { %263 = vmatprep.subr.bf16.mxu1 %v276_v0  ;;  %116 = vmatprep.subr.bf16.mxu0 %v98_v50 }
  0x19   :  { %264 = vmatpush3.bf16.msra.mxu1 %v99_v56  ;;  %117 = vmatpush1.bf16.msra.mxu0 %v97_v57 }
  0x1a   :  { %265 = vmatprep.subr.bf16.mxu1 %v276_v0  ;;  %118 = vmatprep.subr.bf16.mxu0 %v101_v59 }
  0x1d   :  { %266 = vmatpush3.bf16.msra.mxu1 %v102_v2  ;;  %119 = vmatpush1.bf16.msra.mxu0 %v100_v3 }
  0x1e   :  { %267 = vmatprep.subr.bf16.mxu1 %v276_v0  ;;  %120 = vmatprep.subr.bf16.mxu0 %v104_v5  ;;  %v220_v0 = vrot.slane %v211_v18, %v219_v19 }
  0x21   :  { %268 = vmatpush3.bf16.msra.mxu1 %v105_v9  ;;  %121 = vmatpush1.bf16.msra.mxu0 %v103_v10 }
  0x24   :  { %270 = vmatmul.mubr.bf16.vlgmr.msra.gmra.mrb[0].mxu1 %v33_v13  ;;  %139 = vmatmul.mubr.bf16.vlgmr.msra.gmra.mrb[0].mxu0 %v33_v13 }
  0xf7   :  { %v183_v22 = vpop.f32.mrb[0].mxu1  ;;  %v140_v23 = vpop.f32.mrb[0].mxu0 }
  0xf8   :  { %v271_v24 = vpop.f32.mrb[1].mxu1  ;;  %v142_v25 = vpop.f32.mrb[1].mxu0  ;;  %v230_v28 = vadd.f32 %v224_v20, %v183_v22  ;;  %v228_v29 = vadd.f32 %v216_v21, %v140_v23 }
  0xf9   :  { %v186_v26 = vpop.f32.mrb[2].mxu1  ;;  %v144_v27 = vpop.f32.mrb[2].mxu0  ;;  %v229_v32 = vadd.f32 %v220_v0, %v142_v25 }
  0xfa   :  { %v272_v30 = vpop.f32.mrb[3].mxu1  ;;  %v146_v31 = vpop.f32.mrb[3].mxu0  ;;  %236 = vst [vmem:[%s482_s3 + $0x10] sm:$0xff] %v230_v28  ;;  %234 = vst [vmem:[%s482_s3] sm:$0xff] %v228_v29  ;;  %v233_v33 = vadd.f32 %v224_v20, %v186_v26  ;;  %v231_v34 = vadd.f32 %v216_v21, %v144_v27 }
  0xfb   :  { %235 = vst [vmem:[%s482_s3 + $0x8] sm:$0xff] %v229_v32  ;;  %v232_v35 = vadd.f32 %v220_v0, %v146_v31 }
  0xfc   :  { %239 = vst [vmem:[%s482_s3 + $0x28] sm:$0xff] %v233_v33  ;;  %237 = vst [vmem:[%s482_s3 + $0x18] sm:$0xff] %v231_v34 }
  0xfd   :  { %238 = vst [vmem:[%s482_s3 + $0x20] sm:$0xff] %v232_v35 }

// kernel: decoder_layer.14
= control target key start
LH: loop header
LB: loop body
LE: loop exit
PB: predicated region body
PF: predicated region fallthrough
CT: control target
= control target key end

     0   :  { %s839_s9 = smov 0   ;;  %s952_s0 = inlined_call_operand.vmem [shape: f32[2,8,384], index: 0, kind: input, shape index: {}]   ;;  %s953_s1 = inlined_call_operand.vmem [shape: s32[2,8,8], index: 1, kind: input, shape index: {}]   ;;  %s954_s2 = inlined_call_operand.vmem [shape: f32[2,8,128], index: 2, kind: output, shape index: {}]  }
   0x1 LB: > { %s699_s10 = sadd.s32 4294967295, %s817_s9   ;;  %p703_p0 = scmp.ge.s32.totalorder %s817_s9, 1  ;;  %s817_s9 = sphi %s839_s9, %s12_s9  }
   0x2   : > { %p121_p1 = scmp.lt.s32.totalorder %s817_s9, 3 }
   0x4   : > { %p122_p2 = pnand %p703_p0, %p121_p1 }
   0x5   : > { %p146_p3 = scmp.lt.s32.totalorder (!%p122_p2), %s699_s10, 1  ;;  %v819_v0 = vmov (!%p122_p2), 0.0   ;;  %vm820_vm0 = vmmov (!%p122_p2), 0   ;;  %vm167_vm1 = vcmask (!%p122_p2), 261120   ;;  %s821_s15 = smov (!%p122_p2), 96   ;;  %vm217_vm3 = vcmask (!%p122_p2), 64512  }
   0x6   : > { %125 = sbr.rel (%p122_p2) target bundleno = 1170 (0x492), region = 28  ;;  %733 = vmatprep.subr.bf16.mxu0 (!%p122_p2), %v819_v0  ;;  %735 = vmatprep.mubr.msk.bf16.mxu0 (!%p122_p2), %vm820_vm0, %v819_v0  ;;  %s822_s16 = smov (!%p122_p2), 64   ;;  %vm231_vm4 = vcmask (!%p122_p2), 1043456   ;;  %vm629_vm5 = vcmask (!%p122_p2), 523264   ;;  %vm631_vm6 = vcmask (!%p122_p2), 785408  }
   0x7   : > { %739 = vmatprep.subr.bf16.mxu1 (!%p122_p2), %v819_v0  ;;  %741 = vmatprep.mubr.msk.bf16.mxu1 (!%p122_p2), %vm820_vm0, %v819_v0  ;;  %s823_s17 = smov (!%p122_p2), 32  }
   0xd   : > { %s956_s10 = smov (!%p146_p3, %s699_s10), 1 }
   0xe   : > { %s781_s11 = smul.u32 24, %s956_s10  ;;  %s705_s18 = sshll.u32 %s956_s10, 3 }
   0xf   : > { %s154_s21 = scalar_lea.vmem %s953_s1, %s705_s18  ;;  %s158_s24 = scalar_lea.vmem %s954_s2, %s705_s18 }
  0x10   : > { %s859_s14 = scalar_lea.vmem %s952_s0, %s781_s11  ;;  %v879_v6 = vld [vmem:[%s154_s21] sm:$0xff] }
  0x11   : > { %v161_v1 = vld [vmem:[%s859_s14 + $0x8] sm:$0xff]  ;;  %v160_v4 = vld [vmem:[%s859_s14] sm:$0xff]  ;;  %vm215_vm2 = vcmp.eq.s32.totalorder %v879_v6, 0  ;;  %v162_v14 = vld [vmem:[%s859_s14 + $0x10] sm:$0xff] }
  0x12   : > { %v165_v2 = vpack.c.bf16 %v161_v1, %v161_v1  ;;  %v164_v5 = vpack.c.bf16 %v160_v4, %v160_v4  ;;  %v166_v15 = vpack.c.bf16 %v162_v14, %v162_v14 }
  0x14   : > { %v172_v3 = vsel %vm167_vm1, %v165_v2, 0  ;;  %278 = vrot.lane.b32.xlu1 %v164_v5, %s821_s15  ;;  %v233_v16 = vsel %vm231_vm4, %v166_v15, 0 }
  0x15   : > { %734 = vmatpush3.bf16.xpose.msra.mxu0 %v172_v3  ;;  %740 = vmatpush3.bf16.msra.mxu1 %v233_v16 }
  0x16   : > { %751 = vmatprep.subr.bf16.mxu0 %v819_v0  ;;  %745 = vmatprep.subr.bf16.mxu1 %v819_v0 }
  0x18   : > { %394 = vrot.lane.b32.xlu1 %v165_v2, %s822_s16 }
  0x1c   : > { %736 = vmatmul.mubr.msk.bf16.vlgmr.msra.gmra.mrb[0].mxu0 %vm167_vm1, %v164_v5  ;;  %392 = vrot.lane.b32.xlu1 %v164_v5, %s822_s16 }
  0x1d   : > { %753 = vmatprep.mubr.msk.bf16.mxu0 %vm820_vm0, %v819_v0 }
  0x20   : > { %506 = vrot.lane.b32.xlu1 %v165_v2, %s823_s17 }
  0x24   : > { %504 = vrot.lane.b32.xlu1 %v164_v5, %s823_s17 }
  0x86   : > { %v279_v22 = vpop.permute.xlu1 %278 }
  0x8a   : > { %v395_v25 = vpop.permute.xlu1 %394 }
  0x8b   : > { %v400_v26 = vsel %vm167_vm1, %v395_v25, 0 }
  0x8e   : > { %v393_v27 = vpop.permute.xlu1 %392 }
  0x92   : > { %v507_v28 = vpop.permute.xlu1 %506 }
  0x93   : > { %v512_v29 = vsel %vm167_vm1, %v507_v28, 0 }
  0x96   : > { %v505_v30 = vpop.permute.xlu1 %504 }
  0xef   : > { %v208_v7 = vpop.f32.mrb[0].mxu0 }
  0xf0   : > { %v214_v8 = vmul.f32 0.17677669, %v208_v7  ;;  %v737_v9 = vpop.f32.mrb[1].mxu0 }
  0xf1   : > { %v211_v10 = vpop.f32.mrb[2].mxu0 }
  0xf2   : > { %v738_v11 = vpop.f32.mrb[3].mxu0  ;;  %v216_v12 = vsel %vm215_vm2, -1e+09, %v214_v8 }
  0xf3   : > { %v218_v13 = vsel %vm217_vm3, %v216_v12, -inf }
  0xf4   : > { %219 = vmax.xlane.f32.xlu0 %v218_v13 }
 0x10a   : > { %281 = vrot.lane.b32.xlu0 %v165_v2, %s821_s15 }
 0x181   : > { %v220_v17 = vpop.xlane.xlu0 %219 }
 0x182   : > { %v221_v18 = vsub.f32 %v216_v12, %v220_v17 }
 0x184   : > { %v222_v19 = vmul.f32 1.442695, %v221_v18 }
 0x185   : > { %v282_v20 = vpop.permute.xlu0 %281 }
 0x186   : > { %795 = vpow2.f32 %v222_v19  ;;  %v287_v23 = vsel %vm167_vm1, %v282_v20, 0 }
 0x190   : > { %v889_v21 = vpop.eup %795 }
 0x191   : > { %v227_v24 = vpack.c.bf16 %v889_v21, %v889_v21  ;;  %v224_v17 = vsel %vm217_vm3, %v889_v21, 0.0 }
 0x193   : > { %742 = vmatmul.mubr.msk.bf16.vlgmr.msra.gmra.mrb[0].mxu1 %vm217_vm3, %v227_v24 }
 0x194   : > { %746 = vmatpush3.bf16.xpose.msra.mxu1 %v287_v23  ;;  %747 = vmatprep.mubr.msk.bf16.mxu1 %vm820_vm0, %v819_v0 }
 0x195   : > { %757 = vmatprep.subr.bf16.mxu1 %v819_v0 }
 0x19b   : > { %748 = vmatmul.mubr.msk.bf16.vlgmr.msra.gmra.mrb[4].mxu1 %vm167_vm1, %v279_v22 }
 0x19c   : > { %758 = vmatpush3.bf16.xpose.msra.mxu1 %v400_v26  ;;  %759 = vmatprep.mubr.msk.bf16.mxu1 %vm820_vm0, %v819_v0 }
 0x19d   : > { %769 = vmatprep.subr.bf16.mxu1 %v819_v0 }
 0x1a3   : > { %760 = vmatmul.mubr.msk.bf16.vlgmr.msra.gmra.mrb[8].mxu1 %vm167_vm1, %v393_v27 }
 0x1a4   : > { %770 = vmatpush3.bf16.xpose.msra.mxu1 %v512_v29  ;;  %771 = vmatprep.mubr.msk.bf16.mxu1 %vm820_vm0, %v819_v0 }
 0x1ab   : > { %772 = vmatmul.mubr.msk.bf16.vlgmr.msra.gmra.mrb[12].mxu1 %vm167_vm1, %v505_v30 }
 0x266   : > { %v908_v31 = vpop.f32.mrb[0].mxu1 }
 0x267   : > { %v743_v32 = vpop.f32.mrb[1].mxu1 }
 0x268   : > { %v272_v33 = vpop.f32.mrb[2].mxu1 }
 0x269   : > { %v744_v34 = vpop.f32.mrb[3].mxu1 }
 0x26e   : > { %v323_v35 = vpop.f32.mrb[4].mxu1 }
 0x26f   : > { %v329_v36 = vmul.f32 0.17677669, %v323_v35  ;;  %v749_v37 = vpop.f32.mrb[5].mxu1 }
 0x270   : > { %v326_v38 = vpop.f32.mrb[6].mxu1 }
 0x271   : > { %v750_v39 = vpop.f32.mrb[7].mxu1  ;;  %v330_v40 = vsel %vm215_vm2, -1e+09, %v329_v36 }
 0x272   : > { %v331_v41 = vsel %vm217_vm3, %v330_v40, -inf }
 0x273   : > { %332 = vmax.xlane.f32.xlu1 %v331_v41 }
 0x276   : > { %v436_v42 = vpop.f32.mrb[8].mxu1 }
 0x277   : > { %v442_v43 = vmul.f32 0.17677669, %v436_v42  ;;  %v761_v44 = vpop.f32.mrb[9].mxu1 }
 0x278   : > { %v439_v45 = vpop.f32.mrb[10].mxu1 }
 0x279   : > { %v443_v46 = vsel %vm215_vm2, -1e+09, %v442_v43  ;;  %v762_v47 = vpop.f32.mrb[11].mxu1 }
 0x27a   : > { %v444_v48 = vsel %vm217_vm3, %v443_v46, -inf }
 0x27b   : > { %445 = vmax.xlane.f32.xlu0 %v444_v48 }
 0x27e   : > { %v548_v49 = vpop.f32.mrb[12].mxu1 }
 0x27f   : > { %v773_v50 = vpop.f32.mrb[13].mxu1  ;;  %v554_v53 = vmul.f32 0.17677669, %v548_v49 }
 0x280   : > { %v551_v51 = vpop.f32.mrb[14].mxu1 }
 0x281   : > { %v774_v52 = vpop.f32.mrb[15].mxu1  ;;  %v555_v54 = vsel %vm215_vm2, -1e+09, %v554_v53 }
 0x282   : > { %v556_v55 = vsel %vm217_vm3, %v555_v54, -inf }
 0x284   : > { %454 = vrot.lane.b32.xlu1 %v166_v15, %s822_s16 }
 0x291   : > { %342 = vrot.lane.b32.xlu0 %v166_v15, %s821_s15 }
 0x2a8   : > { %557 = vmax.xlane.f32.xlu1 %v556_v55 }
 0x2b9   : > { %566 = vrot.lane.b32.xlu1 %v166_v15, %s823_s17 }
 0x300   : > { %v333_v56 = vpop.xlane.xlu1 %332 }
 0x301   : > { %v334_v57 = vsub.f32 %v330_v40, %v333_v56 }
 0x303   : > { %v335_v58 = vmul.f32 1.442695, %v334_v57 }
 0x304   : > { %v455_v2 = vpop.permute.xlu1 %454 }
 0x305   : > { %797 = vpow2.f32 %v335_v58  ;;  %v460_v5 = vsel %vm231_vm4, %v455_v2, 0 }
 0x308   : > { %v446_v59 = vpop.xlane.xlu0 %445 }
 0x309   : > { %v447_v60 = vsub.f32 %v443_v46, %v446_v59 }
 0x30b   : > { %v448_v61 = vmul.f32 1.442695, %v447_v60 }
 0x30c   : > { %v343_v62 = vpop.permute.xlu0 %342 }
 0x30d   : > { %799 = vpow2.f32 %v448_v61  ;;  %v348_v63 = vsel %vm231_vm4, %v343_v62, 0 }
 0x30e   : > { %752 = vmatpush3.bf16.msra.mxu0 %v348_v63 }
 0x30f   : > { %v798_v1 = vpop.eup %797  ;;  %763 = vmatprep.subr.bf16.mxu0 %v819_v0 }
 0x310   : > { %v337_v3 = vsel %vm217_vm3, %v798_v1, 0.0  ;;  %v340_v4 = vpack.c.bf16 %v798_v1, %v798_v1 }
 0x311   : > { %338 = vadd.xlane.f32.xlu0 %v337_v3 }
 0x312   : > { %754 = vmatmul.mubr.msk.bf16.vlgmr.msra.gmra.mrb[4].mxu0 %vm217_vm3, %v340_v4 }
 0x313   : > { %764 = vmatpush3.bf16.msra.mxu0 %v460_v5  ;;  %765 = vmatprep.mubr.msk.bf16.mxu0 %vm820_vm0, %v819_v0 }
 0x314   : > { %775 = vmatprep.subr.bf16.mxu0 %v819_v0 }
 0x317   : > { %v800_v6 = vpop.eup %799 }
 0x318   : > { %v450_v7 = vsel %vm217_vm3, %v800_v6, 0.0  ;;  %v453_v8 = vpack.c.bf16 %v800_v6, %v800_v6 }
 0x319   : > { %451 = vadd.xlane.f32.xlu1 %v450_v7 }
 0x31a   : > { %766 = vmatmul.mubr.msk.bf16.vlgmr.msra.gmra.mrb[8].mxu0 %vm217_vm3, %v453_v8 }
 0x31b   : > { %777 = vmatprep.mubr.msk.bf16.mxu0 %vm820_vm0, %v819_v0 }
 0x335   : > { %v558_v9 = vpop.xlane.xlu1 %557 }
 0x336   : > { %v559_v10 = vsub.f32 %v555_v54, %v558_v9 }
 0x338   : > { %v560_v11 = vmul.f32 1.442695, %v559_v10 }
 0x339   : > { %v567_v12 = vpop.permute.xlu1 %566 }
 0x33a   : > { %801 = vpow2.f32 %v560_v11  ;;  %v572_v13 = vsel %vm231_vm4, %v567_v12, 0 }
 0x33b   : > { %776 = vmatpush3.bf16.msra.mxu0 %v572_v13 }
 0x344   : > { %v802_v14 = vpop.eup %801 }
 0x345   : > { %v562_v15 = vsel %vm217_vm3, %v802_v14, 0.0  ;;  %v565_v16 = vpack.c.bf16 %v802_v14, %v802_v14 }
 0x346   : > { %563 = vadd.xlane.f32.xlu0 %v562_v15 }
 0x347   : > { %778 = vmatmul.mubr.msk.bf16.vlgmr.msra.gmra.mrb[12].mxu0 %vm217_vm3, %v565_v16 }
 0x34a   : > { %225 = vadd.xlane.f32.xlu0 %v224_v17 }
 0x39e   : > { %v339_v0 = vpop.xlane.xlu0 %338 }
 0x39f   : > { %803 = vrcp.f32 %v339_v0 }
 0x3a6   : > { %v452_v18 = vpop.xlane.xlu1 %451 }
 0x3a7   : > { %805 = vrcp.f32 %v452_v18 }
 0x3a9   : > { %v804_v19 = vpop.eup %803 }
 0x3b1   : > { %v806_v26 = vpop.eup %805 }
 0x3d3   : > { %v564_v32 = vpop.xlane.xlu0 %563 }
 0x3d4   : > { %807 = vrcp.f32 %v564_v32 }
 0x3d7   : > { %v226_v39 = vpop.xlane.xlu0 %225 }
 0x3d8   : > { %809 = vrcp.f32 %v226_v39 }
 0x3de   : > { %v808_v33 = vpop.eup %807 }
 0x3e2   : > { %v810_v40 = vpop.eup %809 }
 0x3e3   : > { %v276_v42 = vmul.f32 %v810_v40, %v908_v31 }
 0x3e5   : > { %v384_v20 = vpop.f32.mrb[4].mxu0 }
 0x3e6   : > { %v391_v22 = vmul.f32 %v804_v19, %v384_v20  ;;  %v755_v23 = vpop.f32.mrb[5].mxu0 }
 0x3e7   : > { %v387_v24 = vpop.f32.mrb[6].mxu0 }
 0x3e8   : > { %617 = vrot.lane.b32.xlu1 %v391_v22, %s823_s17  ;;  %v756_v25 = vpop.f32.mrb[7].mxu0 }
 0x3ed   : > { %v496_v27 = vpop.f32.mrb[8].mxu0 }
 0x3ee   : > { %v503_v28 = vmul.f32 %v806_v26, %v496_v27  ;;  %v767_v29 = vpop.f32.mrb[9].mxu0 }
 0x3ef   : > { %v499_v30 = vpop.f32.mrb[10].mxu0 }
 0x3f0   : > { %621 = vrot.lane.b32.xlu0 %v503_v28, %s822_s16  ;;  %v768_v21 = vpop.f32.mrb[11].mxu0 }
 0x41a   : > { %v608_v34 = vpop.f32.mrb[12].mxu0 }
 0x41b   : > { %v615_v35 = vmul.f32 %v808_v33, %v608_v34  ;;  %v779_v36 = vpop.f32.mrb[13].mxu0 }
 0x41c   : > { %v611_v37 = vpop.f32.mrb[14].mxu0 }
 0x41d   : > { %625 = vrot.lane.b32.xlu1 %v615_v35, %s821_s15  ;;  %v780_v38 = vpop.f32.mrb[15].mxu0 }
 0x45a   : > { %v618_v41 = vpop.permute.xlu1 %617 }
 0x45b   : > { %v628_v44 = vsel %vm167_vm1, %v276_v42, %v618_v41 }
 0x462   : > { %v622_v43 = vpop.permute.xlu0 %621 }
 0x463   : > { %v630_v45 = vsel %vm629_vm5, %v628_v44, %v622_v43 }
 0x48f   : > { %v626_v46 = vpop.permute.xlu1 %625 }
 0x490   : > { %v632_v47 = vsel %vm631_vm6, %v630_v45, %v626_v46 }
 0x491   : > { %633 = vst [vmem:[%s158_s24] sm:$0xff] %v632_v47 }
 0x492 PF: > { %s12_s9 = sadd.s32 1, %s817_s9  }
 0x493   : > { %p9_p4 = scmp.ge.s32.totalorder %s12_s9, 4  }
 0x495   :  { %11 = sbr.rel (!%p9_p4) target bundleno = 1 (0x1), region = 61 }

// kernel: decoder_layer.17
= control target key start
LH: loop header
LB: loop body
LE: loop exit
PB: predicated region body
PF: predicated region fallthrough
CT: control target
= control target key end

     0   :  { %v147_v0 = vmov 0.0   ;;  %vm148_vm0 = vmmov 0   ;;  %s232_s1 = inlined_call_operand.vmem [shape: f32[128,128], index: 1, kind: input, shape index: {}]   ;;  %s233_s0 = inlined_call_operand.vmem [shape: f32[16,128], index: 0, kind: input, shape index: {}]   ;;  %s234_s2 = inlined_call_operand.vmem [shape: f32[1,128], index: 2, kind: input, shape index: {}]   ;;  %s235_s3 = inlined_call_operand.vmem [shape: f32[16,128], index: 3, kind: output, shape index: {}]  }
   0x1   :  { %125 = vmatprep.subr.bf16.mxu0 %v147_v0  ;;  %v26_v1 = vld [vmem:[%s232_s1] sm:$0xff]  ;;  %v27_v2 = vld [vmem:[%s232_s1 + $0x8] sm:$0xff]  ;;  %v28_v3 = vld [vmem:[%s232_s1 + $0x10] sm:$0xff]  ;;  %141 = vmatprep.mubr.msk.bf16.mxu0 %vm148_vm0, %v147_v0 }
   0x2   :  { %v42_v4 = vpack.c.bf16 %v27_v2, %v26_v1  ;;  %v29_v5 = vld [vmem:[%s232_s1 + $0x18] sm:$0xff]  ;;  %v30_v7 = vld [vmem:[%s232_s1 + $0x20] sm:$0xff]  ;;  %v31_v8 = vld [vmem:[%s232_s1 + $0x28] sm:$0xff] }
   0x3   :  { %v43_v6 = vpack.c.bf16 %v29_v5, %v28_v3  ;;  %v44_v9 = vpack.c.bf16 %v31_v8, %v30_v7  ;;  %v32_v10 = vld [vmem:[%s232_s1 + $0x30] sm:$0xff]  ;;  %v33_v11 = vld [vmem:[%s232_s1 + $0x38] sm:$0xff]  ;;  %v34_v13 = vld [vmem:[%s232_s1 + $0x40] sm:$0xff] }
   0x4   :  { %126 = vmatpush3.bf16.msra.mxu0 %v42_v4  ;;  %v45_v12 = vpack.c.bf16 %v33_v11, %v32_v10  ;;  %v35_v14 = vld [vmem:[%s232_s1 + $0x48] sm:$0xff]  ;;  %v36_v16 = vld [vmem:[%s232_s1 + $0x50] sm:$0xff]  ;;  %v37_v17 = vld [vmem:[%s232_s1 + $0x58] sm:$0xff] }
   0x5   :  { %127 = vmatprep.subr.bf16.mxu0 %v147_v0  ;;  %v46_v15 = vpack.c.bf16 %v35_v14, %v34_v13  ;;  %v47_v18 = vpack.c.bf16 %v37_v17, %v36_v16  ;;  %v38_v19 = vld [vmem:[%s232_s1 + $0x60] sm:$0xff]  ;;  %v39_v20 = vld [vmem:[%s232_s1 + $0x68] sm:$0xff]  ;;  %v40_v22 = vld [vmem:[%s232_s1 + $0x70] sm:$0xff] }
   0x6   :  { %v48_v21 = vpack.c.bf16 %v39_v20, %v38_v19  ;;  %v41_v23 = vld [vmem:[%s232_s1 + $0x78] sm:$0xff]  ;;  %v23_v25 = vld [vmem:[%s233_s0] sm:$0xff]  ;;  %v24_v26 = vld [vmem:[%s233_s0 + $0x8] sm:$0xff] }
   0x7   :  { %v49_v24 = vpack.c.bf16 %v41_v23, %v40_v22  ;;  %v25_v27 = vpack.c.bf16 %v24_v26, %v23_v25  ;;  %v115_v29 = vld [vmem:[%s234_s2] ss:$0 sm:$0xff] }
   0x8   :  { %128 = vmatpush3.bf16.msra.mxu0 %v43_v6 }
   0x9   :  { %129 = vmatprep.subr.bf16.mxu0 %v147_v0 }
   0xc   :  { %130 = vmatpush3.bf16.msra.mxu0 %v44_v9 }
   0xd   :  { %131 = vmatprep.subr.bf16.mxu0 %v147_v0 }
  0x10   :  { %132 = vmatpush3.bf16.msra.mxu0 %v45_v12 }
  0x11   :  { %133 = vmatprep.subr.bf16.mxu0 %v147_v0 }
  0x14   :  { %134 = vmatpush3.bf16.msra.mxu0 %v46_v15 }
  0x15   :  { %135 = vmatprep.subr.bf16.mxu0 %v147_v0 }
  0x18   :  { %136 = vmatpush3.bf16.msra.mxu0 %v47_v18 }
  0x19   :  { %137 = vmatprep.subr.bf16.mxu0 %v147_v0 }
  0x1c   :  { %138 = vmatpush3.bf16.msra.mxu0 %v48_v21 }
  0x1d   :  { %139 = vmatprep.subr.bf16.mxu0 %v147_v0 }
  0x20   :  { %140 = vmatpush3.bf16.msra.mxu0 %v49_v24 }
  0x23   :  { %142 = vmatmul.mubr.bf16.vlgmr.msra.gmra.mrb[0].mxu0 %v25_v27 }
  0xf6   :  { %v84_v28 = vpop.f32.mrb[0].mxu0 }
  0xf7   :  { %v143_v30 = vpop.f32.mrb[1].mxu0  ;;  %v107_v32 = vadd.f32 %v115_v29, %v84_v28 }
  0xf8   :  { %v87_v31 = vpop.f32.mrb[2].mxu0 }
  0xf9   :  { %v144_v33 = vpop.f32.mrb[3].mxu0  ;;  %109 = vst [vmem:[%s235_s3] sm:$0xff] %v107_v32  ;;  %v108_v34 = vadd.f32 %v115_v29, %v87_v31 }
  0xfb   :  { %110 = vst [vmem:[%s235_s3 + $0x8] sm:$0xff] %v108_v34 }

// kernel: decoder_layer.18
= control target key start
LH: loop header
LB: loop body
LE: loop exit
PB: predicated region body
PF: predicated region fallthrough
CT: control target
= control target key end

     0   :  { %v162_v3 = vmov 0   ;;  %v138_v52 = vlaneseq  ;;  %s300_s1 = inlined_call_operand.vmem [shape: f32[128,256], index: 1, kind: input, shape index: {}]   ;;  %s301_s0 = inlined_call_operand.vmem [shape: f32[16,128], index: 0, kind: input, shape index: {}]   ;;  %s302_s2 = inlined_call_operand.vmem [shape: f32[1,256], index: 2, kind: input, shape index: {}]   ;;  %s303_s3 = inlined_call_operand.vmem [shape: f32[16,256], index: 3, kind: output, shape index: {}]  }
   0x1   :  { %v31_v0 = vld [vmem:[%s300_s1 + $0x8] sm:$0xff]  ;;  %v33_v1 = vld [vmem:[%s300_s1 + $0x18] sm:$0xff]  ;;  %v30_v2 = vld [vmem:[%s300_s1] sm:$0xff]  ;;  %110 = vmatprep.mubr.bf16.mxu0 %v162_v3 }
   0x2   :  { %v63_v4 = vpack.c.bf16 %v33_v1, %v31_v0  ;;  %v32_v5 = vld [vmem:[%s300_s1 + $0x10] sm:$0xff]  ;;  %v35_v6 = vld [vmem:[%s300_s1 + $0x28] sm:$0xff]  ;;  %v37_v7 = vld [vmem:[%s300_s1 + $0x38] sm:$0xff]  ;;  %v139_v53 = vshrl.u32 %v138_v52, 7 }
   0x3   :  { %v62_v8 = vpack.c.bf16 %v32_v5, %v30_v2  ;;  %v65_v9 = vpack.c.bf16 %v37_v7, %v35_v6  ;;  %v34_v10 = vld [vmem:[%s300_s1 + $0x20] sm:$0xff]  ;;  %v36_v11 = vld [vmem:[%s300_s1 + $0x30] sm:$0xff]  ;;  %v39_v12 = vld [vmem:[%s300_s1 + $0x48] sm:$0xff] }
   0x4   :  { %78 = vmatprep.subr.bf16.mxu0 %v63_v4  ;;  %v41_v13 = vld [vmem:[%s300_s1 + $0x58] sm:$0xff]  ;;  %v64_v14 = vpack.c.bf16 %v36_v11, %v34_v10  ;;  %v38_v16 = vld [vmem:[%s300_s1 + $0x40] sm:$0xff]  ;;  %v40_v17 = vld [vmem:[%s300_s1 + $0x50] sm:$0xff]  ;;  %v140_v54 = vsub.s32 0, %v139_v53  ;;  %v144_v56 = vsub.s32 1, %v139_v53 }
   0x5   :  { %79 = vmatpush1.bf16.msra.mxu0 %v62_v8  ;;  %v67_v15 = vpack.c.bf16 %v41_v13, %v39_v12  ;;  %v43_v18 = vld [vmem:[%s300_s1 + $0x68] sm:$0xff]  ;;  %v45_v19 = vld [vmem:[%s300_s1 + $0x78] sm:$0xff]  ;;  %v66_v20 = vpack.c.bf16 %v40_v17, %v38_v16  ;;  %v42_v22 = vld [vmem:[%s300_s1 + $0x60] sm:$0xff] }
   0x6   :  { %80 = vmatprep.subr.bf16.mxu0 %v65_v9  ;;  %v69_v21 = vpack.c.bf16 %v45_v19, %v43_v18  ;;  %v44_v23 = vld [vmem:[%s300_s1 + $0x70] sm:$0xff]  ;;  %v47_v24 = vld [vmem:[%s300_s1 + $0x88] sm:$0xff]  ;;  %v49_v25 = vld [vmem:[%s300_s1 + $0x98] sm:$0xff] }
   0x7   :  { %v68_v26 = vpack.c.bf16 %v44_v23, %v42_v22  ;;  %v71_v27 = vpack.c.bf16 %v49_v25, %v47_v24  ;;  %v46_v28 = vld [vmem:[%s300_s1 + $0x80] sm:$0xff]  ;;  %v48_v29 = vld [vmem:[%s300_s1 + $0x90] sm:$0xff]  ;;  %v51_v30 = vld [vmem:[%s300_s1 + $0xa8] sm:$0xff] }
   0x8   :  { %v53_v31 = vld [vmem:[%s300_s1 + $0xb8] sm:$0xff]  ;;  %v70_v32 = vpack.c.bf16 %v48_v29, %v46_v28  ;;  %v50_v34 = vld [vmem:[%s300_s1 + $0xa0] sm:$0xff]  ;;  %v52_v35 = vld [vmem:[%s300_s1 + $0xb0] sm:$0xff] }
   0x9   :  { %81 = vmatpush1.bf16.msra.mxu0 %v64_v14  ;;  %v73_v33 = vpack.c.bf16 %v53_v31, %v51_v30  ;;  %v55_v36 = vld [vmem:[%s300_s1 + $0xc8] sm:$0xff]  ;;  %v57_v37 = vld [vmem:[%s300_s1 + $0xd8] sm:$0xff]  ;;  %v72_v38 = vpack.c.bf16 %v52_v35, %v50_v34  ;;  %v54_v40 = vld [vmem:[%s300_s1 + $0xc0] sm:$0xff] }
   0xa   :  { %82 = vmatprep.subr.bf16.mxu0 %v67_v15  ;;  %v75_v39 = vpack.c.bf16 %v57_v37, %v55_v36  ;;  %v56_v41 = vld [vmem:[%s300_s1 + $0xd0] sm:$0xff]  ;;  %v59_v42 = vld [vmem:[%s300_s1 + $0xe8] sm:$0xff]  ;;  %v61_v43 = vld [vmem:[%s300_s1 + $0xf8] sm:$0xff] }
   0xb   :  { %v74_v44 = vpack.c.bf16 %v56_v41, %v54_v40  ;;  %v77_v45 = vpack.c.bf16 %v61_v43, %v59_v42  ;;  %v58_v46 = vld [vmem:[%s300_s1 + $0xe0] sm:$0xff]  ;;  %v60_v47 = vld [vmem:[%s300_s1 + $0xf0] sm:$0xff]  ;;  %v28_v50 = vld [vmem:[%s301_s0 + $0x8] sm:$0xff] }
   0xc   :  { %v76_v48 = vpack.c.bf16 %v60_v47, %v58_v46  ;;  %v27_v49 = vld [vmem:[%s301_s0] sm:$0xff] }
   0xd   :  { %83 = vmatpush1.bf16.msra.mxu0 %v66_v20  ;;  %v29_v51 = vpack.c.bf16 %v28_v50, %v27_v49  ;;  %v136_v55 = vld [vmem:[%s302_s2] sm:$0x3] }
   0xe   :  { %84 = vmatprep.subr.bf16.mxu0 %v69_v21  ;;  %v141_v57 = vrot.slane %v136_v55, %v140_v54  ;;  %v145_v59 = vrot.slane %v136_v55, %v144_v56 }
  0x11   :  { %85 = vmatpush1.bf16.msra.mxu0 %v68_v26 }
  0x12   :  { %86 = vmatprep.subr.bf16.mxu0 %v71_v27 }
  0x15   :  { %87 = vmatpush1.bf16.msra.mxu0 %v70_v32 }
  0x16   :  { %88 = vmatprep.subr.bf16.mxu0 %v73_v33 }
  0x19   :  { %89 = vmatpush1.bf16.msra.mxu0 %v72_v38 }
  0x1a   :  { %90 = vmatprep.subr.bf16.mxu0 %v75_v39 }
  0x1d   :  { %91 = vmatpush1.bf16.msra.mxu0 %v74_v44 }
  0x1e   :  { %92 = vmatprep.subr.bf16.mxu0 %v77_v45 }
  0x21   :  { %93 = vmatpush1.bf16.msra.mxu0 %v76_v48 }
  0x24   :  { %111 = vmatmul.mubr.bf16.vlgmr.msra.gmra.mrb[0].mxu0 %v29_v51 }
  0xf7   :  { %v112_v58 = vpop.f32.mrb[0].mxu0 }
  0xf8   :  { %v114_v60 = vpop.f32.mrb[1].mxu0  ;;  %v148_v62 = vadd.f32 %v141_v57, %v112_v58 }
  0xf9   :  { %v116_v61 = vpop.f32.mrb[2].mxu0  ;;  %v149_v0 = vadd.f32 %v145_v59, %v114_v60 }
  0xfa   :  { %v118_v63 = vpop.f32.mrb[3].mxu0  ;;  %152 = vst [vmem:[%s303_s3] sm:$0xff] %v148_v62  ;;  %v150_v1 = vadd.f32 %v141_v57, %v116_v61 }
  0xfb   :  { %153 = vst [vmem:[%s303_s3 + $0x8] sm:$0xff] %v149_v0  ;;  %v151_v2 = vadd.f32 %v145_v59, %v118_v63 }
  0xfc   :  { %154 = vst [vmem:[%s303_s3 + $0x10] sm:$0xff] %v150_v1 }
  0xfd   :  { %155 = vst [vmem:[%s303_s3 + $0x18] sm:$0xff] %v151_v2 }

// kernel: decoder_layer.22
= control target key start
LH: loop header
LB: loop body
LE: loop exit
PB: predicated region body
PF: predicated region fallthrough
CT: control target
= control target key end

     0   :  { %v166_v3 = vmov 0   ;;  %v138_v52 = vlaneseq  ;;  %s304_s1 = inlined_call_operand.vmem [shape: f32[128,256], index: 1, kind: input, shape index: {}]   ;;  %s305_s0 = inlined_call_operand.vmem [shape: f32[16,128], index: 0, kind: input, shape index: {}]   ;;  %s306_s2 = inlined_call_operand.vmem [shape: f32[1,256], index: 2, kind: input, shape index: {}]   ;;  %s307_s3 = inlined_call_operand.vmem [shape: f32[16,256], index: 3, kind: output, shape index: {}]  }
   0x1   :  { %v31_v0 = vld [vmem:[%s304_s1 + $0x8] sm:$0xff]  ;;  %v33_v1 = vld [vmem:[%s304_s1 + $0x18] sm:$0xff]  ;;  %v30_v2 = vld [vmem:[%s304_s1] sm:$0xff]  ;;  %110 = vmatprep.mubr.bf16.mxu0 %v166_v3 }
   0x2   :  { %v63_v4 = vpack.c.bf16 %v33_v1, %v31_v0  ;;  %v32_v5 = vld [vmem:[%s304_s1 + $0x10] sm:$0xff]  ;;  %v35_v6 = vld [vmem:[%s304_s1 + $0x28] sm:$0xff]  ;;  %v37_v7 = vld [vmem:[%s304_s1 + $0x38] sm:$0xff]  ;;  %v139_v53 = vshrl.u32 %v138_v52, 7 }
   0x3   :  { %v62_v8 = vpack.c.bf16 %v32_v5, %v30_v2  ;;  %v65_v9 = vpack.c.bf16 %v37_v7, %v35_v6  ;;  %v34_v10 = vld [vmem:[%s304_s1 + $0x20] sm:$0xff]  ;;  %v36_v11 = vld [vmem:[%s304_s1 + $0x30] sm:$0xff]  ;;  %v39_v12 = vld [vmem:[%s304_s1 + $0x48] sm:$0xff] }
   0x4   :  { %78 = vmatprep.subr.bf16.mxu0 %v63_v4  ;;  %v41_v13 = vld [vmem:[%s304_s1 + $0x58] sm:$0xff]  ;;  %v64_v14 = vpack.c.bf16 %v36_v11, %v34_v10  ;;  %v38_v16 = vld [vmem:[%s304_s1 + $0x40] sm:$0xff]  ;;  %v40_v17 = vld [vmem:[%s304_s1 + $0x50] sm:$0xff]  ;;  %v140_v54 = vsub.s32 0, %v139_v53  ;;  %v144_v56 = vsub.s32 1, %v139_v53 }
   0x5   :  { %79 = vmatpush1.bf16.msra.mxu0 %v62_v8  ;;  %v67_v15 = vpack.c.bf16 %v41_v13, %v39_v12  ;;  %v43_v18 = vld [vmem:[%s304_s1 + $0x68] sm:$0xff]  ;;  %v45_v19 = vld [vmem:[%s304_s1 + $0x78] sm:$0xff]  ;;  %v66_v20 = vpack.c.bf16 %v40_v17, %v38_v16  ;;  %v42_v22 = vld [vmem:[%s304_s1 + $0x60] sm:$0xff] }
   0x6   :  { %80 = vmatprep.subr.bf16.mxu0 %v65_v9  ;;  %v69_v21 = vpack.c.bf16 %v45_v19, %v43_v18  ;;  %v44_v23 = vld [vmem:[%s304_s1 + $0x70] sm:$0xff]  ;;  %v47_v24 = vld [vmem:[%s304_s1 + $0x88] sm:$0xff]  ;;  %v49_v25 = vld [vmem:[%s304_s1 + $0x98] sm:$0xff] }
   0x7   :  { %v68_v26 = vpack.c.bf16 %v44_v23, %v42_v22  ;;  %v71_v27 = vpack.c.bf16 %v49_v25, %v47_v24  ;;  %v46_v28 = vld [vmem:[%s304_s1 + $0x80] sm:$0xff]  ;;  %v48_v29 = vld [vmem:[%s304_s1 + $0x90] sm:$0xff]  ;;  %v51_v30 = vld [vmem:[%s304_s1 + $0xa8] sm:$0xff] }
   0x8   :  { %v53_v31 = vld [vmem:[%s304_s1 + $0xb8] sm:$0xff]  ;;  %v70_v32 = vpack.c.bf16 %v48_v29, %v46_v28  ;;  %v50_v34 = vld [vmem:[%s304_s1 + $0xa0] sm:$0xff]  ;;  %v52_v35 = vld [vmem:[%s304_s1 + $0xb0] sm:$0xff] }
   0x9   :  { %81 = vmatpush1.bf16.msra.mxu0 %v64_v14  ;;  %v73_v33 = vpack.c.bf16 %v53_v31, %v51_v30  ;;  %v55_v36 = vld [vmem:[%s304_s1 + $0xc8] sm:$0xff]  ;;  %v57_v37 = vld [vmem:[%s304_s1 + $0xd8] sm:$0xff]  ;;  %v72_v38 = vpack.c.bf16 %v52_v35, %v50_v34  ;;  %v54_v40 = vld [vmem:[%s304_s1 + $0xc0] sm:$0xff] }
   0xa   :  { %82 = vmatprep.subr.bf16.mxu0 %v67_v15  ;;  %v75_v39 = vpack.c.bf16 %v57_v37, %v55_v36  ;;  %v56_v41 = vld [vmem:[%s304_s1 + $0xd0] sm:$0xff]  ;;  %v59_v42 = vld [vmem:[%s304_s1 + $0xe8] sm:$0xff]  ;;  %v61_v43 = vld [vmem:[%s304_s1 + $0xf8] sm:$0xff] }
   0xb   :  { %v74_v44 = vpack.c.bf16 %v56_v41, %v54_v40  ;;  %v77_v45 = vpack.c.bf16 %v61_v43, %v59_v42  ;;  %v58_v46 = vld [vmem:[%s304_s1 + $0xe0] sm:$0xff]  ;;  %v60_v47 = vld [vmem:[%s304_s1 + $0xf0] sm:$0xff]  ;;  %v28_v50 = vld [vmem:[%s305_s0 + $0x8] sm:$0xff] }
   0xc   :  { %v76_v48 = vpack.c.bf16 %v60_v47, %v58_v46  ;;  %v27_v49 = vld [vmem:[%s305_s0] sm:$0xff] }
   0xd   :  { %83 = vmatpush1.bf16.msra.mxu0 %v66_v20  ;;  %v29_v51 = vpack.c.bf16 %v28_v50, %v27_v49  ;;  %v136_v55 = vld [vmem:[%s306_s2] sm:$0x3] }
   0xe   :  { %84 = vmatprep.subr.bf16.mxu0 %v69_v21  ;;  %v141_v57 = vrot.slane %v136_v55, %v140_v54  ;;  %v145_v59 = vrot.slane %v136_v55, %v144_v56 }
  0x11   :  { %85 = vmatpush1.bf16.msra.mxu0 %v68_v26 }
  0x12   :  { %86 = vmatprep.subr.bf16.mxu0 %v71_v27 }
  0x15   :  { %87 = vmatpush1.bf16.msra.mxu0 %v70_v32 }
  0x16   :  { %88 = vmatprep.subr.bf16.mxu0 %v73_v33 }
  0x19   :  { %89 = vmatpush1.bf16.msra.mxu0 %v72_v38 }
  0x1a   :  { %90 = vmatprep.subr.bf16.mxu0 %v75_v39 }
  0x1d   :  { %91 = vmatpush1.bf16.msra.mxu0 %v74_v44 }
  0x1e   :  { %92 = vmatprep.subr.bf16.mxu0 %v77_v45 }
  0x21   :  { %93 = vmatpush1.bf16.msra.mxu0 %v76_v48 }
  0x24   :  { %111 = vmatmul.mubr.bf16.vlgmr.msra.gmra.mrb[0].mxu0 %v29_v51 }
  0xf7   :  { %v112_v58 = vpop.f32.mrb[0].mxu0 }
  0xf8   :  { %v114_v60 = vpop.f32.mrb[1].mxu0  ;;  %v148_v62 = vadd.f32 %v141_v57, %v112_v58 }
  0xf9   :  { %v116_v61 = vpop.f32.mrb[2].mxu0  ;;  %v149_v0 = vadd.f32 %v145_v59, %v114_v60 }
  0xfa   :  { %v118_v63 = vpop.f32.mrb[3].mxu0  ;;  %v152_v1 = vmax.f32 %v148_v62, 0.0  ;;  %v150_v2 = vadd.f32 %v141_v57, %v116_v61 }
  0xfb   :  { %v153_v3 = vmax.f32 %v149_v0, 0.0  ;;  %v151_v4 = vadd.f32 %v145_v59, %v118_v63 }
  0xfc   :  { %156 = vst [vmem:[%s307_s3] sm:$0xff] %v152_v1  ;;  %v154_v5 = vmax.f32 %v150_v2, 0.0 }
  0xfd   :  { %157 = vst [vmem:[%s307_s3 + $0x8] sm:$0xff] %v153_v3  ;;  %v155_v6 = vmax.f32 %v151_v4, 0.0 }
  0xfe   :  { %158 = vst [vmem:[%s307_s3 + $0x10] sm:$0xff] %v154_v5 }
  0xff   :  { %159 = vst [vmem:[%s307_s3 + $0x18] sm:$0xff] %v155_v6 }

// kernel: decoder_layer.19
= control target key start
LH: loop header
LB: loop body
LE: loop exit
PB: predicated region body
PF: predicated region fallthrough
CT: control target
= control target key end

     0   :  { %s902_s12 = smov 0   ;;  %s1014_s0 = inlined_call_operand.vmem [shape: f32[2,8,128], index: 0, kind: input, shape index: {}]   ;;  %s1015_s1 = inlined_call_operand.vmem [shape: f32[2,8,256], index: 1, kind: input, shape index: {}]   ;;  %s1016_s2 = inlined_call_operand.vmem [shape: s32[2,8,8], index: 2, kind: input, shape index: {}]   ;;  %s1017_s3 = inlined_call_operand.vmem [shape: f32[2,8,128], index: 3, kind: output, shape index: {}]  }
   0x1 LB: > { %s755_s13 = sadd.s32 4294967295, %s875_s12   ;;  %p759_p0 = scmp.ge.s32.totalorder %s875_s12, 1  ;;  %s875_s12 = sphi %s902_s12, %s13_s12  }
   0x2   : > { %p155_p1 = scmp.lt.s32.totalorder %s875_s12, 3 }
   0x4   : > { %p156_p2 = pnand %p759_p0, %p155_p1 }
   0x5   : > { %p186_p3 = scmp.lt.s32.totalorder (!%p156_p2), %s755_s13, 1  ;;  %v877_v0 = vmov (!%p156_p2), 0.0   ;;  %vm878_vm0 = vmmov (!%p156_p2), 0   ;;  %vm211_vm1 = vcmask (!%p156_p2), 261120   ;;  %s879_s22 = smov (!%p156_p2), 96   ;;  %vm261_vm3 = vcmask (!%p156_p2), 64512  }
   0x6   : > { %159 = sbr.rel (%p156_p2) target bundleno = 1169 (0x491), region = 32  ;;  %792 = vmatprep.subr.bf16.mxu0 (!%p156_p2), %v877_v0  ;;  %794 = vmatprep.mubr.msk.bf16.mxu0 (!%p156_p2), %vm878_vm0, %v877_v0  ;;  %s880_s23 = smov (!%p156_p2), 64   ;;  %vm275_vm4 = vcmask (!%p156_p2), 1043456   ;;  %vm673_vm5 = vcmask (!%p156_p2), 523264   ;;  %vm675_vm6 = vcmask (!%p156_p2), 785408  }
   0x7   : > { %798 = vmatprep.subr.bf16.mxu1 (!%p156_p2), %v877_v0  ;;  %800 = vmatprep.mubr.msk.bf16.mxu1 (!%p156_p2), %vm878_vm0, %v877_v0  ;;  %s881_s24 = smov (!%p156_p2), 32  }
   0xd   : > { %s1019_s13 = smov (!%p186_p3, %s755_s13), 1 }
   0xe   : > { %s775_s14 = sshll.u32 %s1019_s13, 4  ;;  %s916_s15 = sshll.u32 %s1019_s13, 3 }
   0xf   : > { %s921_s18 = scalar_lea.vmem %s1015_s1, %s775_s14  ;;  %s189_s21 = scalar_lea.vmem %s1014_s0, %s916_s15 }
  0x10   : > { %v205_v1 = vld [vmem:[%s921_s18] sm:$0xff]  ;;  %s198_s27 = scalar_lea.vmem %s1016_s2, %s916_s15  ;;  %v206_v14 = vld [vmem:[%s921_s18 + $0x8] sm:$0xff]  ;;  %s202_s30 = scalar_lea.vmem %s1017_s3, %s916_s15 }
  0x11   : > { %v209_v2 = vpack.c.bf16 %v205_v1, %v205_v1  ;;  %v204_v4 = vld [vmem:[%s189_s21] sm:$0xff]  ;;  %v210_v15 = vpack.c.bf16 %v206_v14, %v206_v14 }
  0x12   : > { %v208_v5 = vpack.c.bf16 %v204_v4, %v204_v4  ;;  %v942_v6 = vld [vmem:[%s198_s27] sm:$0xff] }
  0x13   : > { %v216_v3 = vsel %vm211_vm1, %v209_v2, 0  ;;  %vm259_vm2 = vcmp.eq.s32.totalorder %v942_v6, 0  ;;  %v277_v16 = vsel %vm275_vm4, %v210_v15, 0 }
  0x14   : > { %793 = vmatpush3.bf16.xpose.msra.mxu0 %v216_v3  ;;  %322 = vrot.lane.b32.xlu1 %v208_v5, %s879_s22 }
  0x15   : > { %810 = vmatprep.subr.bf16.mxu0 %v877_v0  ;;  %799 = vmatpush3.bf16.msra.mxu1 %v277_v16 }
  0x16   : > { %804 = vmatprep.subr.bf16.mxu1 %v877_v0 }
  0x18   : > { %438 = vrot.lane.b32.xlu1 %v209_v2, %s880_s23 }
  0x1b   : > { %795 = vmatmul.mubr.msk.bf16.vlgmr.msra.gmra.mrb[0].mxu0 %vm211_vm1, %v208_v5 }
  0x1c   : > { %812 = vmatprep.mubr.msk.bf16.mxu0 %vm878_vm0, %v877_v0  ;;  %436 = vrot.lane.b32.xlu1 %v208_v5, %s880_s23 }
  0x20   : > { %550 = vrot.lane.b32.xlu1 %v209_v2, %s881_s24 }
  0x24   : > { %548 = vrot.lane.b32.xlu1 %v208_v5, %s881_s24 }
  0x86   : > { %v323_v22 = vpop.permute.xlu1 %322 }
  0x8a   : > { %v439_v25 = vpop.permute.xlu1 %438 }
  0x8b   : > { %v444_v26 = vsel %vm211_vm1, %v439_v25, 0 }
  0x8e   : > { %v437_v27 = vpop.permute.xlu1 %436 }
  0x92   : > { %v551_v28 = vpop.permute.xlu1 %550 }
  0x93   : > { %v556_v29 = vsel %vm211_vm1, %v551_v28, 0 }
  0x96   : > { %v549_v30 = vpop.permute.xlu1 %548 }
  0xee   : > { %v252_v7 = vpop.f32.mrb[0].mxu0 }
  0xef   : > { %v258_v8 = vmul.f32 0.17677669, %v252_v7  ;;  %v796_v9 = vpop.f32.mrb[1].mxu0 }
  0xf0   : > { %v255_v10 = vpop.f32.mrb[2].mxu0 }
  0xf1   : > { %v797_v11 = vpop.f32.mrb[3].mxu0  ;;  %v260_v12 = vsel %vm259_vm2, -1e+09, %v258_v8 }
  0xf2   : > { %v262_v13 = vsel %vm261_vm3, %v260_v12, -inf }
  0xf3   : > { %263 = vmax.xlane.f32.xlu0 %v262_v13 }
 0x109   : > { %325 = vrot.lane.b32.xlu0 %v209_v2, %s879_s22 }
 0x180   : > { %v264_v17 = vpop.xlane.xlu0 %263 }
 0x181   : > { %v265_v18 = vsub.f32 %v260_v12, %v264_v17 }
 0x183   : > { %v266_v19 = vmul.f32 1.442695, %v265_v18 }
 0x184   : > { %v326_v20 = vpop.permute.xlu0 %325 }
 0x185   : > { %853 = vpow2.f32 %v266_v19  ;;  %v331_v23 = vsel %vm211_vm1, %v326_v20, 0 }
 0x18f   : > { %v952_v21 = vpop.eup %853 }
 0x190   : > { %v271_v24 = vpack.c.bf16 %v952_v21, %v952_v21  ;;  %v268_v17 = vsel %vm261_vm3, %v952_v21, 0.0 }
 0x192   : > { %801 = vmatmul.mubr.msk.bf16.vlgmr.msra.gmra.mrb[0].mxu1 %vm261_vm3, %v271_v24 }
 0x193   : > { %805 = vmatpush3.bf16.xpose.msra.mxu1 %v331_v23  ;;  %806 = vmatprep.mubr.msk.bf16.mxu1 %vm878_vm0, %v877_v0 }
 0x194   : > { %816 = vmatprep.subr.bf16.mxu1 %v877_v0 }
 0x19a   : > { %807 = vmatmul.mubr.msk.bf16.vlgmr.msra.gmra.mrb[4].mxu1 %vm211_vm1, %v323_v22 }
 0x19b   : > { %817 = vmatpush3.bf16.xpose.msra.mxu1 %v444_v26  ;;  %818 = vmatprep.mubr.msk.bf16.mxu1 %vm878_vm0, %v877_v0 }
 0x19c   : > { %828 = vmatprep.subr.bf16.mxu1 %v877_v0 }
 0x1a2   : > { %819 = vmatmul.mubr.msk.bf16.vlgmr.msra.gmra.mrb[8].mxu1 %vm211_vm1, %v437_v27 }
 0x1a3   : > { %829 = vmatpush3.bf16.xpose.msra.mxu1 %v556_v29  ;;  %830 = vmatprep.mubr.msk.bf16.mxu1 %vm878_vm0, %v877_v0 }
 0x1aa   : > { %831 = vmatmul.mubr.msk.bf16.vlgmr.msra.gmra.mrb[12].mxu1 %vm211_vm1, %v549_v30 }
 0x265   : > { %v971_v31 = vpop.f32.mrb[0].mxu1 }
 0x266   : > { %v802_v32 = vpop.f32.mrb[1].mxu1 }
 0x267   : > { %v316_v33 = vpop.f32.mrb[2].mxu1 }
 0x268   : > { %v803_v34 = vpop.f32.mrb[3].mxu1 }
 0x26d   : > { %v367_v35 = vpop.f32.mrb[4].mxu1 }
 0x26e   : > { %v373_v36 = vmul.f32 0.17677669, %v367_v35  ;;  %v808_v37 = vpop.f32.mrb[5].mxu1 }
 0x26f   : > { %v370_v38 = vpop.f32.mrb[6].mxu1 }
 0x270   : > { %v809_v39 = vpop.f32.mrb[7].mxu1  ;;  %v374_v40 = vsel %vm259_vm2, -1e+09, %v373_v36 }
 0x271   : > { %v375_v41 = vsel %vm261_vm3, %v374_v40, -inf }
 0x272   : > { %376 = vmax.xlane.f32.xlu1 %v375_v41 }
 0x275   : > { %v480_v42 = vpop.f32.mrb[8].mxu1 }
 0x276   : > { %v486_v43 = vmul.f32 0.17677669, %v480_v42  ;;  %v820_v44 = vpop.f32.mrb[9].mxu1 }
 0x277   : > { %v483_v45 = vpop.f32.mrb[10].mxu1 }
 0x278   : > { %v487_v46 = vsel %vm259_vm2, -1e+09, %v486_v43  ;;  %v821_v47 = vpop.f32.mrb[11].mxu1 }
 0x279   : > { %v488_v48 = vsel %vm261_vm3, %v487_v46, -inf }
 0x27a   : > { %489 = vmax.xlane.f32.xlu0 %v488_v48 }
 0x27d   : > { %v592_v49 = vpop.f32.mrb[12].mxu1 }
 0x27e   : > { %v832_v50 = vpop.f32.mrb[13].mxu1  ;;  %v598_v53 = vmul.f32 0.17677669, %v592_v49 }
 0x27f   : > { %v595_v51 = vpop.f32.mrb[14].mxu1 }
 0x280   : > { %v833_v52 = vpop.f32.mrb[15].mxu1  ;;  %v599_v54 = vsel %vm259_vm2, -1e+09, %v598_v53 }
 0x281   : > { %v600_v55 = vsel %vm261_vm3, %v599_v54, -inf }
 0x283   : > { %498 = vrot.lane.b32.xlu1 %v210_v15, %s880_s23 }
 0x290   : > { %386 = vrot.lane.b32.xlu0 %v210_v15, %s879_s22 }
 0x2a7   : > { %601 = vmax.xlane.f32.xlu1 %v600_v55 }
 0x2b8   : > { %610 = vrot.lane.b32.xlu1 %v210_v15, %s881_s24 }
 0x2ff   : > { %v377_v56 = vpop.xlane.xlu1 %376 }
 0x300   : > { %v378_v57 = vsub.f32 %v374_v40, %v377_v56 }
 0x302   : > { %v379_v58 = vmul.f32 1.442695, %v378_v57 }
 0x303   : > { %v499_v2 = vpop.permute.xlu1 %498 }
 0x304   : > { %855 = vpow2.f32 %v379_v58  ;;  %v504_v5 = vsel %vm275_vm4, %v499_v2, 0 }
 0x307   : > { %v490_v59 = vpop.xlane.xlu0 %489 }
 0x308   : > { %v491_v60 = vsub.f32 %v487_v46, %v490_v59 }
 0x30a   : > { %v492_v61 = vmul.f32 1.442695, %v491_v60 }
 0x30b   : > { %v387_v62 = vpop.permute.xlu0 %386 }
 0x30c   : > { %857 = vpow2.f32 %v492_v61  ;;  %v392_v63 = vsel %vm275_vm4, %v387_v62, 0 }
 0x30d   : > { %811 = vmatpush3.bf16.msra.mxu0 %v392_v63 }
 0x30e   : > { %v856_v1 = vpop.eup %855  ;;  %822 = vmatprep.subr.bf16.mxu0 %v877_v0 }
 0x30f   : > { %v381_v3 = vsel %vm261_vm3, %v856_v1, 0.0  ;;  %v384_v4 = vpack.c.bf16 %v856_v1, %v856_v1 }
 0x310   : > { %382 = vadd.xlane.f32.xlu0 %v381_v3 }
 0x311   : > { %813 = vmatmul.mubr.msk.bf16.vlgmr.msra.gmra.mrb[4].mxu0 %vm261_vm3, %v384_v4 }
 0x312   : > { %823 = vmatpush3.bf16.msra.mxu0 %v504_v5  ;;  %824 = vmatprep.mubr.msk.bf16.mxu0 %vm878_vm0, %v877_v0 }
 0x313   : > { %834 = vmatprep.subr.bf16.mxu0 %v877_v0 }
 0x316   : > { %v858_v6 = vpop.eup %857 }
 0x317   : > { %v494_v7 = vsel %vm261_vm3, %v858_v6, 0.0  ;;  %v497_v8 = vpack.c.bf16 %v858_v6, %v858_v6 }
 0x318   : > { %495 = vadd.xlane.f32.xlu1 %v494_v7 }
 0x319   : > { %825 = vmatmul.mubr.msk.bf16.vlgmr.msra.gmra.mrb[8].mxu0 %vm261_vm3, %v497_v8 }
 0x31a   : > { %836 = vmatprep.mubr.msk.bf16.mxu0 %vm878_vm0, %v877_v0 }
 0x334   : > { %v602_v9 = vpop.xlane.xlu1 %601 }
 0x335   : > { %v603_v10 = vsub.f32 %v599_v54, %v602_v9 }
 0x337   : > { %v604_v11 = vmul.f32 1.442695, %v603_v10 }
 0x338   : > { %v611_v12 = vpop.permute.xlu1 %610 }
 0x339   : > { %859 = vpow2.f32 %v604_v11  ;;  %v616_v13 = vsel %vm275_vm4, %v611_v12, 0 }
 0x33a   : > { %835 = vmatpush3.bf16.msra.mxu0 %v616_v13 }
 0x343   : > { %v860_v14 = vpop.eup %859 }
 0x344   : > { %v606_v15 = vsel %vm261_vm3, %v860_v14, 0.0  ;;  %v609_v16 = vpack.c.bf16 %v860_v14, %v860_v14 }
 0x345   : > { %607 = vadd.xlane.f32.xlu0 %v606_v15 }
 0x346   : > { %837 = vmatmul.mubr.msk.bf16.vlgmr.msra.gmra.mrb[12].mxu0 %vm261_vm3, %v609_v16 }
 0x349   : > { %269 = vadd.xlane.f32.xlu0 %v268_v17 }
 0x39d   : > { %v383_v0 = vpop.xlane.xlu0 %382 }
 0x39e   : > { %861 = vrcp.f32 %v383_v0 }
 0x3a5   : > { %v496_v18 = vpop.xlane.xlu1 %495 }
 0x3a6   : > { %863 = vrcp.f32 %v496_v18 }
 0x3a8   : > { %v862_v19 = vpop.eup %861 }
 0x3b0   : > { %v864_v26 = vpop.eup %863 }
 0x3d2   : > { %v608_v32 = vpop.xlane.xlu0 %607 }
 0x3d3   : > { %865 = vrcp.f32 %v608_v32 }
 0x3d6   : > { %v270_v39 = vpop.xlane.xlu0 %269 }
 0x3d7   : > { %867 = vrcp.f32 %v270_v39 }
 0x3dd   : > { %v866_v33 = vpop.eup %865 }
 0x3e1   : > { %v868_v40 = vpop.eup %867 }
 0x3e2   : > { %v320_v42 = vmul.f32 %v868_v40, %v971_v31 }
 0x3e4   : > { %v428_v20 = vpop.f32.mrb[4].mxu0 }
 0x3e5   : > { %v435_v22 = vmul.f32 %v862_v19, %v428_v20  ;;  %v814_v23 = vpop.f32.mrb[5].mxu0 }
 0x3e6   : > { %v431_v24 = vpop.f32.mrb[6].mxu0 }
 0x3e7   : > { %661 = vrot.lane.b32.xlu1 %v435_v22, %s881_s24  ;;  %v815_v25 = vpop.f32.mrb[7].mxu0 }
 0x3ec   : > { %v540_v27 = vpop.f32.mrb[8].mxu0 }
 0x3ed   : > { %v547_v28 = vmul.f32 %v864_v26, %v540_v27  ;;  %v826_v29 = vpop.f32.mrb[9].mxu0 }
 0x3ee   : > { %v543_v30 = vpop.f32.mrb[10].mxu0 }
 0x3ef   : > { %665 = vrot.lane.b32.xlu0 %v547_v28, %s880_s23  ;;  %v827_v21 = vpop.f32.mrb[11].mxu0 }
 0x419   : > { %v652_v34 = vpop.f32.mrb[12].mxu0 }
 0x41a   : > { %v659_v35 = vmul.f32 %v866_v33, %v652_v34  ;;  %v838_v36 = vpop.f32.mrb[13].mxu0 }
 0x41b   : > { %v655_v37 = vpop.f32.mrb[14].mxu0 }
 0x41c   : > { %669 = vrot.lane.b32.xlu1 %v659_v35, %s879_s22  ;;  %v839_v38 = vpop.f32.mrb[15].mxu0 }
 0x459   : > { %v662_v41 = vpop.permute.xlu1 %661 }
 0x45a   : > { %v672_v44 = vsel %vm211_vm1, %v320_v42, %v662_v41 }
 0x461   : > { %v666_v43 = vpop.permute.xlu0 %665 }
 0x462   : > { %v674_v45 = vsel %vm673_vm5, %v672_v44, %v666_v43 }
 0x48e   : > { %v670_v46 = vpop.permute.xlu1 %669 }
 0x48f   : > { %v676_v47 = vsel %vm675_vm6, %v674_v45, %v670_v46 }
 0x490   : > { %677 = vst [vmem:[%s202_s30] sm:$0xff] %v676_v47 }
 0x491 PF: > { %s13_s12 = sadd.s32 1, %s875_s12  }
 0x492   : > { %p10_p4 = scmp.ge.s32.totalorder %s13_s12, 4  }
 0x494   :  { %12 = sbr.rel (!%p10_p4) target bundleno = 1 (0x1), region = 68 }

// kernel: decoder_layer.23
= control target key start
LH: loop header
LB: loop body
LE: loop exit
PB: predicated region body
PF: predicated region fallthrough
CT: control target
= control target key end

     0   :  { %s370_s0 = inlined_call_operand.vmem [shape: f32[16,256], index: 0, kind: input, shape index: {}]   ;;  %s371_s1 = inlined_call_operand.vmem [shape: f32[256,128], index: 1, kind: input, shape index: {}]   ;;  %s372_s2 = inlined_call_operand.vmem [shape: f32[1,128], index: 2, kind: input, shape index: {}]   ;;  %s373_s3 = inlined_call_operand.vmem [shape: f32[16,128], index: 3, kind: input, shape index: {}]   ;;  %s374_s4 = inlined_call_operand.hbm [shape: f32[16,128], index: 4, kind: output, shape index: {}]  }
   0x1   :  { %v49_v0 = vld [vmem:[%s371_s1 + $0x80] sm:$0xff]  ;;  %v50_v1 = vld [vmem:[%s371_s1 + $0x88] sm:$0xff]  ;;  %v51_v5 = vld [vmem:[%s371_s1 + $0x90] sm:$0xff] }
   0x2   :  { %v33_v2 = vld [vmem:[%s371_s1] sm:$0xff]  ;;  %v73_v3 = vpack.c.bf16 %v50_v1, %v49_v0  ;;  %v34_v4 = vld [vmem:[%s371_s1 + $0x8] sm:$0xff]  ;;  %v52_v6 = vld [vmem:[%s371_s1 + $0x98] sm:$0xff] }
   0x3   :  { %v65_v7 = vpack.c.bf16 %v34_v4, %v33_v2  ;;  %v74_v8 = vpack.c.bf16 %v52_v6, %v51_v5  ;;  %v35_v9 = vld [vmem:[%s371_s1 + $0x10] sm:$0xff]  ;;  %v36_v10 = vld [vmem:[%s371_s1 + $0x18] sm:$0xff]  ;;  %v53_v11 = vld [vmem:[%s371_s1 + $0xa0] sm:$0xff] }
   0x4   :  { %163 = vmatprep.subr.bf16.mxu0 %v73_v3  ;;  %v54_v12 = vld [vmem:[%s371_s1 + $0xa8] sm:$0xff]  ;;  %v66_v13 = vpack.c.bf16 %v36_v10, %v35_v9  ;;  %v37_v15 = vld [vmem:[%s371_s1 + $0x20] sm:$0xff]  ;;  %v55_v17 = vld [vmem:[%s371_s1 + $0xb0] sm:$0xff] }
   0x5   :  { %164 = vmatpush3.bf16.msra.mxu0 %v65_v7  ;;  %v75_v14 = vpack.c.bf16 %v54_v12, %v53_v11  ;;  %v38_v16 = vld [vmem:[%s371_s1 + $0x28] sm:$0xff]  ;;  %v56_v18 = vld [vmem:[%s371_s1 + $0xb8] sm:$0xff]  ;;  %v39_v21 = vld [vmem:[%s371_s1 + $0x30] sm:$0xff] }
   0x6   :  { %165 = vmatprep.subr.bf16.mxu0 %v74_v8  ;;  %v67_v19 = vpack.c.bf16 %v38_v16, %v37_v15  ;;  %v76_v20 = vpack.c.bf16 %v56_v18, %v55_v17  ;;  %v40_v22 = vld [vmem:[%s371_s1 + $0x38] sm:$0xff]  ;;  %v57_v23 = vld [vmem:[%s371_s1 + $0xc0] sm:$0xff]  ;;  %v58_v24 = vld [vmem:[%s371_s1 + $0xc8] sm:$0xff] }
   0x7   :  { %v28_v25 = vld [vmem:[%s370_s0 + $0x8] sm:$0xff]  ;;  %v30_v26 = vld [vmem:[%s370_s0 + $0x18] sm:$0xff]  ;;  %v68_v27 = vpack.c.bf16 %v40_v22, %v39_v21 }
   0x8   :  { %v32_v28 = vpack.c.bf16 %v30_v26, %v28_v25 }
   0x9   :  { %166 = vmatpush3.bf16.msra.mxu0 %v66_v13 }
   0xa   :  { %167 = vmatprep.subr.bf16.mxu0 %v75_v14 }
   0xd   :  { %168 = vmatpush3.bf16.msra.mxu0 %v67_v19 }
   0xe   :  { %9 = vsyncpa [#allocation3], 0  ;;  %169 = vmatprep.subr.bf16.mxu0 %v76_v20  ;;  %v77_v29 = vpack.c.bf16 %v58_v24, %v57_v23  ;;  %v41_v30 = vld [vmem:[%s371_s1 + $0x40] sm:$0xff]  ;;  %v42_v31 = vld [vmem:[%s371_s1 + $0x48] sm:$0xff]  ;;  %113 = vmatprep.mubr.bf16.mxu0 %v32_v28 }
   0xf   :  { %v59_v32 = vld [vmem:[%s371_s1 + $0xd0] sm:$0xff]  ;;  %v60_v33 = vld [vmem:[%s371_s1 + $0xd8] sm:$0xff]  ;;  %v69_v34 = vpack.c.bf16 %v42_v31, %v41_v30  ;;  %v61_v38 = vld [vmem:[%s371_s1 + $0xe0] sm:$0xff] }
  0x10   :  { %v78_v35 = vpack.c.bf16 %v60_v33, %v59_v32  ;;  %v43_v36 = vld [vmem:[%s371_s1 + $0x50] sm:$0xff]  ;;  %v44_v37 = vld [vmem:[%s371_s1 + $0x58] sm:$0xff]  ;;  %v62_v39 = vld [vmem:[%s371_s1 + $0xe8] sm:$0xff] }
  0x11   :  { %170 = vmatpush3.bf16.msra.mxu0 %v68_v27  ;;  %v70_v40 = vpack.c.bf16 %v44_v37, %v43_v36  ;;  %v79_v41 = vpack.c.bf16 %v62_v39, %v61_v38  ;;  %v45_v42 = vld [vmem:[%s371_s1 + $0x60] sm:$0xff]  ;;  %v46_v43 = vld [vmem:[%s371_s1 + $0x68] sm:$0xff]  ;;  %v63_v44 = vld [vmem:[%s371_s1 + $0xf0] sm:$0xff] }
  0x12   :  { %171 = vmatprep.subr.bf16.mxu0 %v77_v29  ;;  %v64_v45 = vld [vmem:[%s371_s1 + $0xf8] sm:$0xff]  ;;  %v71_v46 = vpack.c.bf16 %v46_v43, %v45_v42  ;;  %v47_v48 = vld [vmem:[%s371_s1 + $0x70] sm:$0xff]  ;;  %v27_v51 = vld [vmem:[%s370_s0] sm:$0xff] }
  0x13   :  { %v80_v47 = vpack.c.bf16 %v64_v45, %v63_v44  ;;  %v48_v49 = vld [vmem:[%s371_s1 + $0x78] sm:$0xff]  ;;  %v29_v52 = vld [vmem:[%s370_s0 + $0x10] sm:$0xff]  ;;  %v162_v58 = vld [vmem:[%s372_s2] ss:$0 sm:$0xff]  ;;  %s213_s0 = smov [#allocation2]  }
  0x14   :  { %v72_v50 = vpack.c.bf16 %v48_v49, %v47_v48  ;;  %v31_v53 = vpack.c.bf16 %v29_v52, %v27_v51  ;;  %v140_v61 = vld [vmem:[%s373_s3] sm:$0xff]  ;;  %s151_s12 = sshll.u32 %s213_s0, 4  ;;  %v141_v63 = vld [vmem:[%s373_s3 + $0x8] sm:$0xff]  ;;  %s152_s12 = int_to_ptr.vmem [resolvable:$true] %s151_s12 }
  0x15   :  { %172 = vmatpush3.bf16.msra.mxu0 %v69_v34  ;;  %s189_s2 = scalar_lea.vmem %s152_s12, 256  ;;  %p194_p1 = scmp.lt.s32.totalorder %s152_s12, %s152_s12 }
  0x16   :  { %173 = vmatprep.subr.bf16.mxu0 %v78_v35  ;;  %p190_p0 = scmp.ne.s32.totalorder %s152_s12, %s189_s2  ;;  %p195_p2 = scmp.lt.s32.totalorder %s189_s2, %s189_s2 }
  0x18   :  { %p196_p3 = por %p195_p2, %p194_p1 }
  0x19   :  { %174 = vmatpush3.bf16.msra.mxu0 %v70_v40 }
  0x1a   :  { %175 = vmatprep.subr.bf16.mxu0 %v79_v41  ;;  %p197_p4 = pnand %p196_p3, %p190_p0 }
  0x1d   :  { %176 = vmatpush3.bf16.msra.mxu0 %v71_v46 }
  0x1e   :  { %177 = vmatprep.subr.bf16.mxu0 %v80_v47 }
  0x21   :  { %178 = vmatpush3.bf16.msra.mxu0 %v72_v50 }
  0x24   :  { %114 = vmatmul.mubr.bf16.vlgmr.msra.gmra.mrb[0].mxu0 %v31_v53 }
  0xf7   :  { %v179_v54 = vpop.f32.mrb[0].mxu0 }
  0xf8   :  { %v180_v55 = vpop.f32.mrb[1].mxu0 }
  0xf9   :  { %v181_v56 = vadd.f32 %v180_v55, %v179_v54  ;;  %v182_v57 = vpop.f32.mrb[2].mxu0 }
  0xfa   :  { %v183_v59 = vpop.f32.mrb[3].mxu0 }
  0xfb   :  { %v184_v60 = vadd.f32 %v183_v59, %v182_v57  ;;  %v138_v62 = vadd.f32 %v181_v56, %v162_v58 }
  0xfd   :  { %v142_v0 = vadd.f32 %v140_v61, %v138_v62  ;;  %v139_v1 = vadd.f32 %v184_v60, %v162_v58 }
  0xff   :  { %144 = vst [vmem:[#allocation2] sm:$0xff] %v142_v0  ;;  %v143_v2 = vadd.f32 %v141_v63, %v139_v1 }
 0x101   :  { %145 = vst [vmem:[#allocation2 + $0x8] sm:$0xff] %v143_v2 }
 0x102   :  { %200 = shalt.err (!%p197_p4)
}
 0x103   :  { %s201_s17 = scalar_lea.hbm %s374_s4, 256 }
 0x104   :  { %p202_p5 = scmp.ne.s32.totalorder %s374_s4, %s201_s17  ;;  %p205_p6 = scmp.lt.u32.totalorder %s201_s17, %s374_s4 }
 0x106   :  { %p207_p7 = pnand %p205_p6, %p202_p5 }
 0x108   :  { %210 = shalt.err (!%p207_p7)
}
 0x109   :  { %s214_s21 = smov 128   ;;  %s215_s22 = smov 8  }
 0x10a   :  { %157 = dma.vmem_to_hbm [thread:$0]  %s152_s12, 256, %s374_s4, [#allocation3], %s214_s21, %s214_s21, %s215_s22  }
 0x10b   :  { %211 = dma.done.wait [#allocation3], 256  }
 0x10c   :  { %212 = vsyncadd [#allocation3], 4294967040 }
 0x10d   :  { %161 = vsyncpa [#allocation3], 1 }

</bundles_post_ra>
